<compile_context>
chip_gen: v7x
topology: tpu7x:2x2x1
jax: 0.10.0
libtpu: 0.0.40
codegen_flags: <defaults>
</compile_context>

<pallas_src>
import functools

import jax
import jax.numpy as jnp
from jax.experimental import pallas as pl
from jax.experimental.pallas import tpu as pltpu

PAD = 64           # padded feature width (hidden dim 50 <= 64; sublane-legal for f32/bf16)
N_LAYERS = 10
IN_DIM = 2
HID_DIM = 50
OUT_DIM = 1
ONES_ROW = PAD - 1  # reserved feature row that carries a constant 1.0 (bias folding)
MAX_TB = 4096      # upper bound on the batch tile


def mlp_kernel(xT_ref, w0_ref, b0_ref, w_ref, o_ref):
    # xT_ref: (IN_DIM, tb) f32          -- transposed input tile (batch on lanes)
    # w0_ref: (PAD, IN_DIM) f32         -- fc1 weight, torch (out, in) layout, zero-padded rows
    # b0_ref: (PAD, 1) f32              -- fc1 bias column; b0[ONES_ROW] = 1.0 seeds the ones row
    # w_ref : (N_LAYERS-1, PAD, PAD) bf16 -- fc2..fc10 weights, bias folded into column ONES_ROW,
    #                                        and w[ONES_ROW, ONES_ROW] = 1 propagates the 1.
    # o_ref : (1, tb) f32               -- fc10 output row (lane-dense store)
    x0 = xT_ref[0:1, :]                      # (1, tb) f32
    x1 = xT_ref[1:2, :]                      # (1, tb) f32
    w0 = w0_ref[...]                         # (PAD, 2) f32

    # fc1 on the VPU (K=2 contraction is not worth an MXU pass): outer-product + bias.
    h = w0[:, 0:1] * x0 + w0[:, 1:2] * x1 + b0_ref[...]   # (PAD, tb) f32
    h = jnp.maximum(h, 0.0).astype(jnp.bfloat16)           # ReLU, then pack to bf16

    # fc2..fc10 on the MXU: bf16 operands, f32 accumulation; bias is already in the weight
    # (ones row carries 1 through every layer), so the loop body is a bare matmul + ReLU.
    for l in range(1, N_LAYERS):                            # static unroll: 9 matmuls
        acc = jnp.dot(w_ref[l - 1], h, preferred_element_type=jnp.float32)
        if l < N_LAYERS - 1:
            h = jnp.maximum(acc, 0.0).astype(jnp.bfloat16)  # ReLU after fc2..fc9
        else:
            h = acc                                         # no ReLU after fc10 (f32)

    # fc10 has OUT_DIM=1: its result lives in padded row 0 -> lane-dense (1, tb) store.
    o_ref[...] = h[0:1, :]


def _choose_tiling(n):
    """Pick (tb, steps): tb <= MAX_TB, grid length even and >= 2 (v7x megacore balance)."""
    steps = max(2, -(-n // MAX_TB))          # ceil(n / MAX_TB), at least 2
    if steps % 2:
        steps += 1
    tb = -(-n // steps)                      # ceil(n / steps)
    tb = -(-tb // 128) * 128                 # round up to lane width
    return tb, steps


@functools.partial(jax.jit, static_argnames=("tb", "steps"))
def _bsm_pallas(x, w0_pad, b0_col, w_rest, *, tb, steps):
    n = x.shape[0]
    n_pad = tb * steps
    # Transposed, batch-padded input: (IN_DIM, n_pad); only ~8*n_pad bytes of wrapper traffic.
    xT = jnp.zeros((IN_DIM, n_pad), jnp.float32).at[:, :n].set(x.astype(jnp.float32).T)

    out = pl.pallas_call(
        mlp_kernel,
        out_shape=jax.ShapeDtypeStruct((1, n_pad), jnp.float32),
        grid_spec=pltpu.PrefetchScalarGridSpec(
            num_scalar_prefetch=0,
            grid=(steps,),
            in_specs=[
                pl.BlockSpec((IN_DIM, tb), lambda i: (0, i)),                 # x tile
                pl.BlockSpec((PAD, IN_DIM), lambda i: (0, 0)),                # fc1 weight
                pl.BlockSpec((PAD, 1), lambda i: (0, 0)),                     # fc1 bias (+ ones seed)
                pl.BlockSpec((N_LAYERS - 1, PAD, PAD), lambda i: (0, 0, 0)),  # fc2..fc10 weights
            ],
            out_specs=pl.BlockSpec((1, tb), lambda i: (0, i)),                # lane-dense output
        ),
        compiler_params=pltpu.CompilerParams(
            dimension_semantics=("parallel",)),
    )(xT, w0_pad, b0_col, w_rest)

    return out[0, :n].reshape(n, OUT_DIM)    # (n, 1) — matches fc10 output


def bsm_forward(x, w0_pad, b0_col, w_rest):
    tb, steps = _choose_tiling(x.shape[0])
    return _bsm_pallas(x, w0_pad, b0_col, w_rest, tb=tb, steps=steps)


def init_params(key):
    """Deterministic PyTorch-Linear-style init (uniform(+/-1/sqrt(fan_in))), packed into the
    padded layouts the kernel expects (biases of fc2..fc10 folded into the bf16 weights).
    Also returns raw f32 params for the pure-JAX reference."""
    dims = [(IN_DIM, HID_DIM)] + [(HID_DIM, HID_DIM)] * 8 + [(HID_DIM, OUT_DIM)]
    keys = jax.random.split(key, 2 * N_LAYERS)

    w0_pad = jnp.zeros((PAD, IN_DIM), jnp.float32)
    b0_col = jnp.zeros((PAD, 1), jnp.float32).at[ONES_ROW, 0].set(1.0)   # seed the ones row
    w_rest = jnp.zeros((N_LAYERS - 1, PAD, PAD), jnp.float32)
    params = []
    for li, (fan_in, fan_out) in enumerate(dims):
        bound = 1.0 / (float(fan_in) ** 0.5)
        w = jax.random.uniform(keys[2 * li], (fan_out, fan_in),      # torch (out, in) layout
                               jnp.float32, minval=-bound, maxval=bound)
        b = jax.random.uniform(keys[2 * li + 1], (fan_out,),
                               jnp.float32, minval=-bound, maxval=bound)
        params.append((w, b))
        if li == 0:
            w0_pad = w0_pad.at[:fan_out, :fan_in].set(w)
            b0_col = b0_col.at[:fan_out, 0].set(b)
        else:
            w_rest = w_rest.at[li - 1, :fan_out, :fan_in].set(w)
            w_rest = w_rest.at[li - 1, :fan_out, ONES_ROW].set(b)     # fold bias into weight
            w_rest = w_rest.at[li - 1, ONES_ROW, ONES_ROW].set(1.0)   # propagate the ones row
    return w0_pad, b0_col, w_rest.astype(jnp.bfloat16), params


def reference_forward(x, params):
    """Pure-JAX f32 reference (no Pallas) for correctness checking."""
    h = x.astype(jnp.float32)
    for li, (w, b) in enumerate(params):     # w: (out, in), b: (out,)
        h = h @ w.T + b
        if li < N_LAYERS - 1:
            h = jnp.maximum(h, 0.0)
    return h


if __name__ == "__main__":
    key = jax.random.PRNGKey(0)
    k_param, k_x = jax.random.split(key)

    w0_pad, b0_col, w_rest, params = init_params(k_param)

    batch = 1024                             # -> tb=512, grid=2 (even; both v7x TCs busy)
    x = jax.random.normal(k_x, (batch, IN_DIM), jnp.float32)

    out = bsm_forward(x, w0_pad, b0_col, w_rest)
    out = jax.block_until_ready(out)

    ref = reference_forward(x, params)
    assert out.shape == (batch, OUT_DIM)
    max_err = float(jnp.max(jnp.abs(out - ref)))
    # bf16 matmul operands / activations (f32 accumulation) -> looser tolerance than pure f32.
    assert jnp.allclose(out, ref, atol=2e-2, rtol=2e-2), f"mismatch vs reference, max|err|={max_err}"

    print("KERNEL_OK")
</pallas_src>

<mosaic_0001>
module attributes {stable_mosaic.version = 11 : i64} {
  func.func @mlp_kernel(%arg0: i32, %arg1: memref<2x512xf32, #tpu.memory_space<vmem>>, %arg2: memref<64x2xf32, #tpu.memory_space<vmem>>, %arg3: memref<64x1xf32, #tpu.memory_space<vmem>>, %arg4: memref<9x64x64xbf16, #tpu.memory_space<vmem>>, %arg5: memref<1x512xf32, #tpu.memory_space<vmem>>) attributes {dimension_semantics = [#tpu.dimension_semantics<parallel>], iteration_bounds = array<i64: 2>, scalar_prefetch = 0 : i64, scratch_operands = 0 : i64, tpu.core_type = #tpu.core_type<tc>, window_params = [{transform_indices = @transform_0, window_bounds = array<i64: 2, 512>}, {pipeline_mode = #tpu.pipeline_mode<synchronous>, transform_indices = @transform_1, window_bounds = array<i64: 64, 2>}, {pipeline_mode = #tpu.pipeline_mode<synchronous>, transform_indices = @transform_2, window_bounds = array<i64: 64, 1>}, {pipeline_mode = #tpu.pipeline_mode<synchronous>, transform_indices = @transform_3, window_bounds = array<i64: 9, 64, 64>}, {transform_indices = @transform_4, window_bounds = array<i64: 1, 512>}]} {
    %c0 = arith.constant 0 : index
    %c0_0 = arith.constant 0 : index
    %0 = vector.load %arg1[%c0, %c0_0] : memref<2x512xf32, #tpu.memory_space<vmem>>, vector<1x512xf32>
    %c1 = arith.constant 1 : index
    %c0_1 = arith.constant 0 : index
    %1 = vector.load %arg1[%c1, %c0_1] : memref<2x512xf32, #tpu.memory_space<vmem>>, vector<1x512xf32>
    %c0_2 = arith.constant 0 : index
    %c0_3 = arith.constant 0 : index
    %2 = vector.load %arg2[%c0_2, %c0_3] : memref<64x2xf32, #tpu.memory_space<vmem>>, vector<64x2xf32>
    %3 = vector.extract_strided_slice %2 {offsets = [0, 0], sizes = [64, 1], strides = [1, 1]} : vector<64x2xf32> to vector<64x1xf32>
    %4 = vector.broadcast %3 : vector<64x1xf32> to vector<64x512xf32>
    %5 = vector.broadcast %0 : vector<1x512xf32> to vector<64x512xf32>
    %6 = arith.mulf %4, %5 : vector<64x512xf32>
    %7 = vector.extract_strided_slice %2 {offsets = [0, 1], sizes = [64, 1], strides = [1, 1]} : vector<64x2xf32> to vector<64x1xf32>
    %8 = vector.broadcast %7 : vector<64x1xf32> to vector<64x512xf32>
    %9 = vector.broadcast %1 : vector<1x512xf32> to vector<64x512xf32>
    %10 = arith.mulf %8, %9 : vector<64x512xf32>
    %11 = arith.addf %6, %10 : vector<64x512xf32>
    %c0_4 = arith.constant 0 : index
    %c0_5 = arith.constant 0 : index
    %12 = vector.load %arg3[%c0_4, %c0_5] : memref<64x1xf32, #tpu.memory_space<vmem>>, vector<64x1xf32>
    %13 = vector.broadcast %12 : vector<64x1xf32> to vector<64x512xf32>
    %14 = arith.addf %11, %13 : vector<64x512xf32>
    %cst = arith.constant 0.000000e+00 : f32
    %15 = vector.broadcast %cst : f32 to vector<64x512xf32>
    %16 = arith.maximumf %14, %15 : vector<64x512xf32>
    %17 = arith.truncf %16 : vector<64x512xf32> to vector<64x512xbf16>
    %c0_6 = arith.constant 0 : index
    %c0_7 = arith.constant 0 : index
    %c0_8 = arith.constant 0 : index
    %18 = vector.load %arg4[%c0_6, %c0_7, %c0_8] : memref<9x64x64xbf16, #tpu.memory_space<vmem>>, vector<1x64x64xbf16>
    %19 = vector.shape_cast %18 : vector<1x64x64xbf16> to vector<64x64xbf16>
    %cst_9 = arith.constant dense<0.000000e+00> : vector<64x512xf32>
    %20 = tpu.matmul %19, %17, %cst_9 {dimension_numbers = #tpu.dot_dimension_numbers<[1], [0], [0], [1], [0, 0, 1, 1], [], []>} : vector<64x64xbf16>, vector<64x512xbf16>, vector<64x512xf32> -> vector<64x512xf32>
    %cst_10 = arith.constant 0.000000e+00 : f32
    %21 = vector.broadcast %cst_10 : f32 to vector<64x512xf32>
    %22 = arith.maximumf %20, %21 : vector<64x512xf32>
    %23 = arith.truncf %22 : vector<64x512xf32> to vector<64x512xbf16>
    %c1_11 = arith.constant 1 : index
    %c0_12 = arith.constant 0 : index
    %c0_13 = arith.constant 0 : index
    %24 = vector.load %arg4[%c1_11, %c0_12, %c0_13] : memref<9x64x64xbf16, #tpu.memory_space<vmem>>, vector<1x64x64xbf16>
    %25 = vector.shape_cast %24 : vector<1x64x64xbf16> to vector<64x64xbf16>
    %cst_14 = arith.constant dense<0.000000e+00> : vector<64x512xf32>
    %26 = tpu.matmul %25, %23, %cst_14 {dimension_numbers = #tpu.dot_dimension_numbers<[1], [0], [0], [1], [0, 0, 1, 1], [], []>} : vector<64x64xbf16>, vector<64x512xbf16>, vector<64x512xf32> -> vector<64x512xf32>
    %cst_15 = arith.constant 0.000000e+00 : f32
    %27 = vector.broadcast %cst_15 : f32 to vector<64x512xf32>
    %28 = arith.maximumf %26, %27 : vector<64x512xf32>
    %29 = arith.truncf %28 : vector<64x512xf32> to vector<64x512xbf16>
    %c2 = arith.constant 2 : index
    %c0_16 = arith.constant 0 : index
    %c0_17 = arith.constant 0 : index
    %30 = vector.load %arg4[%c2, %c0_16, %c0_17] : memref<9x64x64xbf16, #tpu.memory_space<vmem>>, vector<1x64x64xbf16>
    %31 = vector.shape_cast %30 : vector<1x64x64xbf16> to vector<64x64xbf16>
    %cst_18 = arith.constant dense<0.000000e+00> : vector<64x512xf32>
    %32 = tpu.matmul %31, %29, %cst_18 {dimension_numbers = #tpu.dot_dimension_numbers<[1], [0], [0], [1], [0, 0, 1, 1], [], []>} : vector<64x64xbf16>, vector<64x512xbf16>, vector<64x512xf32> -> vector<64x512xf32>
    %cst_19 = arith.constant 0.000000e+00 : f32
    %33 = vector.broadcast %cst_19 : f32 to vector<64x512xf32>
    %34 = arith.maximumf %32, %33 : vector<64x512xf32>
    %35 = arith.truncf %34 : vector<64x512xf32> to vector<64x512xbf16>
    %c3 = arith.constant 3 : index
    %c0_20 = arith.constant 0 : index
    %c0_21 = arith.constant 0 : index
    %36 = vector.load %arg4[%c3, %c0_20, %c0_21] : memref<9x64x64xbf16, #tpu.memory_space<vmem>>, vector<1x64x64xbf16>
    %37 = vector.shape_cast %36 : vector<1x64x64xbf16> to vector<64x64xbf16>
    %cst_22 = arith.constant dense<0.000000e+00> : vector<64x512xf32>
    %38 = tpu.matmul %37, %35, %cst_22 {dimension_numbers = #tpu.dot_dimension_numbers<[1], [0], [0], [1], [0, 0, 1, 1], [], []>} : vector<64x64xbf16>, vector<64x512xbf16>, vector<64x512xf32> -> vector<64x512xf32>
    %cst_23 = arith.constant 0.000000e+00 : f32
    %39 = vector.broadcast %cst_23 : f32 to vector<64x512xf32>
    %40 = arith.maximumf %38, %39 : vector<64x512xf32>
    %41 = arith.truncf %40 : vector<64x512xf32> to vector<64x512xbf16>
    %c4 = arith.constant 4 : index
    %c0_24 = arith.constant 0 : index
    %c0_25 = arith.constant 0 : index
    %42 = vector.load %arg4[%c4, %c0_24, %c0_25] : memref<9x64x64xbf16, #tpu.memory_space<vmem>>, vector<1x64x64xbf16>
    %43 = vector.shape_cast %42 : vector<1x64x64xbf16> to vector<64x64xbf16>
    %cst_26 = arith.constant dense<0.000000e+00> : vector<64x512xf32>
    %44 = tpu.matmul %43, %41, %cst_26 {dimension_numbers = #tpu.dot_dimension_numbers<[1], [0], [0], [1], [0, 0, 1, 1], [], []>} : vector<64x64xbf16>, vector<64x512xbf16>, vector<64x512xf32> -> vector<64x512xf32>
    %cst_27 = arith.constant 0.000000e+00 : f32
    %45 = vector.broadcast %cst_27 : f32 to vector<64x512xf32>
    %46 = arith.maximumf %44, %45 : vector<64x512xf32>
    %47 = arith.truncf %46 : vector<64x512xf32> to vector<64x512xbf16>
    %c5 = arith.constant 5 : index
    %c0_28 = arith.constant 0 : index
    %c0_29 = arith.constant 0 : index
    %48 = vector.load %arg4[%c5, %c0_28, %c0_29] : memref<9x64x64xbf16, #tpu.memory_space<vmem>>, vector<1x64x64xbf16>
    %49 = vector.shape_cast %48 : vector<1x64x64xbf16> to vector<64x64xbf16>
    %cst_30 = arith.constant dense<0.000000e+00> : vector<64x512xf32>
    %50 = tpu.matmul %49, %47, %cst_30 {dimension_numbers = #tpu.dot_dimension_numbers<[1], [0], [0], [1], [0, 0, 1, 1], [], []>} : vector<64x64xbf16>, vector<64x512xbf16>, vector<64x512xf32> -> vector<64x512xf32>
    %cst_31 = arith.constant 0.000000e+00 : f32
    %51 = vector.broadcast %cst_31 : f32 to vector<64x512xf32>
    %52 = arith.maximumf %50, %51 : vector<64x512xf32>
    %53 = arith.truncf %52 : vector<64x512xf32> to vector<64x512xbf16>
    %c6 = arith.constant 6 : index
    %c0_32 = arith.constant 0 : index
    %c0_33 = arith.constant 0 : index
    %54 = vector.load %arg4[%c6, %c0_32, %c0_33] : memref<9x64x64xbf16, #tpu.memory_space<vmem>>, vector<1x64x64xbf16>
    %55 = vector.shape_cast %54 : vector<1x64x64xbf16> to vector<64x64xbf16>
    %cst_34 = arith.constant dense<0.000000e+00> : vector<64x512xf32>
    %56 = tpu.matmul %55, %53, %cst_34 {dimension_numbers = #tpu.dot_dimension_numbers<[1], [0], [0], [1], [0, 0, 1, 1], [], []>} : vector<64x64xbf16>, vector<64x512xbf16>, vector<64x512xf32> -> vector<64x512xf32>
    %cst_35 = arith.constant 0.000000e+00 : f32
    %57 = vector.broadcast %cst_35 : f32 to vector<64x512xf32>
    %58 = arith.maximumf %56, %57 : vector<64x512xf32>
    %59 = arith.truncf %58 : vector<64x512xf32> to vector<64x512xbf16>
    %c7 = arith.constant 7 : index
    %c0_36 = arith.constant 0 : index
    %c0_37 = arith.constant 0 : index
    %60 = vector.load %arg4[%c7, %c0_36, %c0_37] : memref<9x64x64xbf16, #tpu.memory_space<vmem>>, vector<1x64x64xbf16>
    %61 = vector.shape_cast %60 : vector<1x64x64xbf16> to vector<64x64xbf16>
    %cst_38 = arith.constant dense<0.000000e+00> : vector<64x512xf32>
    %62 = tpu.matmul %61, %59, %cst_38 {dimension_numbers = #tpu.dot_dimension_numbers<[1], [0], [0], [1], [0, 0, 1, 1], [], []>} : vector<64x64xbf16>, vector<64x512xbf16>, vector<64x512xf32> -> vector<64x512xf32>
    %cst_39 = arith.constant 0.000000e+00 : f32
    %63 = vector.broadcast %cst_39 : f32 to vector<64x512xf32>
    %64 = arith.maximumf %62, %63 : vector<64x512xf32>
    %65 = arith.truncf %64 : vector<64x512xf32> to vector<64x512xbf16>
    %c8 = arith.constant 8 : index
    %c0_40 = arith.constant 0 : index
    %c0_41 = arith.constant 0 : index
    %66 = vector.load %arg4[%c8, %c0_40, %c0_41] : memref<9x64x64xbf16, #tpu.memory_space<vmem>>, vector<1x64x64xbf16>
    %67 = vector.shape_cast %66 : vector<1x64x64xbf16> to vector<64x64xbf16>
    %cst_42 = arith.constant dense<0.000000e+00> : vector<64x512xf32>
    %68 = tpu.matmul %67, %65, %cst_42 {dimension_numbers = #tpu.dot_dimension_numbers<[1], [0], [0], [1], [0, 0, 1, 1], [], []>} : vector<64x64xbf16>, vector<64x512xbf16>, vector<64x512xf32> -> vector<64x512xf32>
    %69 = vector.extract_strided_slice %68 {offsets = [0, 0], sizes = [1, 512], strides = [1, 1]} : vector<64x512xf32> to vector<1x512xf32>
    %c0_43 = arith.constant 0 : index
    %c0_44 = arith.constant 0 : index
    %70 = vector.load %arg5[%c0_43, %c0_44] : memref<1x512xf32, #tpu.memory_space<vmem>>, vector<1x512xf32>
    tpu.vector_store %arg5[%c0_43, %c0_44], %69 {strides = array<i32>} : memref<1x512xf32, #tpu.memory_space<vmem>>, vector<1x512xf32>,
    return
  }
  func.func @transform_0(%arg0: i32) -> (i32, i32) {
    %c0_i32 = arith.constant 0 : i32
    %c0_i32_0 = arith.constant 0 : i32
    return %c0_i32, %arg0 : i32, i32
  }
  func.func @transform_1(%arg0: i32) -> (i32, i32) {
    %c0_i32 = arith.constant 0 : i32
    %c0_i32_0 = arith.constant 0 : i32
    %c0_i32_1 = arith.constant 0 : i32
    return %c0_i32, %c0_i32_0 : i32, i32
  }
  func.func @transform_2(%arg0: i32) -> (i32, i32) {
    %c0_i32 = arith.constant 0 : i32
    %c0_i32_0 = arith.constant 0 : i32
    %c0_i32_1 = arith.constant 0 : i32
    return %c0_i32, %c0_i32_0 : i32, i32
  }
  func.func @transform_3(%arg0: i32) -> (i32, i32, i32) {
    %c0_i32 = arith.constant 0 : i32
    %c0_i32_0 = arith.constant 0 : i32
    %c0_i32_1 = arith.constant 0 : i32
    %c0_i32_2 = arith.constant 0 : i32
    return %c0_i32, %c0_i32_0, %c0_i32_1 : i32, i32, i32
  }
  func.func @transform_4(%arg0: i32) -> (i32, i32) {
    %c0_i32 = arith.constant 0 : i32
    %c0_i32_0 = arith.constant 0 : i32
    return %c0_i32, %arg0 : i32, i32
  }
}

</mosaic_0001>

<bundles_post_ra>
// kernel: _bsm_pallas.1
= control target key start
LH: loop header
LB: loop body
LE: loop exit
PB: predicated region body
PF: predicated region fallthrough
CT: control target
= control target key end

     0   :  { %9 = vsyncpa [#allocation3], 0  ;;  %s3536_s0 = inlined_call_operand.vmem [shape: f32[2,1024], index: 0, kind: input, shape index: {}]   ;;  %s3537_s1 = inlined_call_operand.vmem [shape: f32[64,2], index: 1, kind: input, shape index: {}]   ;;  %s3538_s2 = inlined_call_operand.vmem [shape: f32[64,1], index: 2, kind: input, shape index: {}]   ;;  %s3539_s3 = inlined_call_operand.hbm [shape: bf16[9,64,64], index: 3, kind: input, shape index: {}]   ;;  %s3540_s4 = inlined_call_operand.hbm [shape: f32[1,1024], index: 4, kind: output, shape index: {}]  }
   0x1   :  { %10 = vsyncpa [#allocation4], 0 }
   0x2   :  { %12 = vsyncpa [#allocation4 + $0x1], 0  ;;  %s3076_s15 = smov 0   ;;  %s3078_s16 = smov 0  }
   0x3   :  { %s3080_s17 = smov 0   ;;  %s3082_s18 = smov 0  }
   0x4 LB: > { %s3097_s19 = sadd.s32 4294967295, %s3042_s18   ;;  %s2723_s20 = sadd.s32 4294967294, %s3042_s18   ;;  %s3042_s18 = sphi %s3082_s18, %s3556_s18   ;;  %s3038_s17 = sphi %s3080_s17, %s3555_s17   ;;  %s3034_s16 = sphi %s3078_s16, %s3554_s16   ;;  %s3030_s15 = sphi %s3076_s15, %s3553_s15  }
   0x5   : > { %s3101_s21 = sadd.s32 1, %s3042_s18   ;;  %s114_s22 = sadd.s32 1, %s3038_s17 }
   0x6   : > { %s111_s23 = ssub.s32 %s3042_s18, %s3101_s21  ;;  %p124_p0 = scmp.ne.s32.totalorder %s3038_s17, %s3034_s16 }
   0x7   : > { %p112_p1 = scmp.eq.s32.totalorder %s111_s23, 0  ;;  %p125_p2 = scmp.eq.s32.totalorder %s3097_s19, 1 }
   0x8   : > { %p130_p3 = scmp.ne.s32.totalorder %s3034_s16, %s3030_s15  ;;  %p131_p4 = scmp.eq.s32.totalorder %s2723_s20, 1 }
   0x9   : > { %s3112_s24 = scalar_select %p112_p1, %s3038_s17, %s114_s22  }
   0xa   : > { %p3114_p5 = por %p125_p2, %p124_p0  ;;  %p3118_p6 = por %p131_p4, %p130_p3 }
   0xb   : > { %p2724_p7 = scmp.ge.s32.totalorder %s3042_s18, 1  ;;  %p138_p8 = scmp.lt.s32.totalorder %s3042_s18, 3 }
   0xc   : > { %s3544_s25 = scalar_select %p3114_p5, 1, 0 }
   0xd   : > { %s3545_s26 = scalar_select %p3118_p6, 1, 0 }
   0xe   : > { %p3541_p9 = scmp.eq.s32.totalorder %s3097_s19, 0  ;;  %p3125_p10 = pnand %p2724_p7, %p138_p8 }
   0xf   : > { %s3044_s28 = smov [#allocation2]   ;;  %s2948_s7 = scalar_lea.hbm %s3539_s3, 4608 }
  0x10   : > { %s3546_s27 = scalar_select %p3125_p10, 1, 0 }
  0x11   : > { %s156_s29 = sshll.u32 %s3044_s28, 4  ;;  %p2853_p11 = pneg %p3125_p10  ;;  %s157_s29 = int_to_ptr.vmem [resolvable:$true] %s156_s29 }
  0x12   : > { %p2949_p13 = scmp.ne.s32.totalorder %s3539_s3, %s2948_s7  ;;  %p2955_p3 = scmp.lt.u32.totalorder %s2948_s7, %s3539_s3 }
  0x13   : > { %p3133_p12 = pnand %p3541_p9, %p2853_p11 }
  0x15   : > { %p2950_p0 = pneg %p3133_p12 }
  0x17   : > { %p2951_p1 = pnand %p2950_p0, %p2949_p13 }
  0x19   : > { %p2952_p2 = pneg %p2951_p1 }
  0x1b   : > { %p2957_p4 = pnand %p2955_p3, %p2952_p2 }
  0x1d   : > { %2960 = shalt.err (!%p2957_p4)
}
  0x1e   : > { %s2961_s12 = scalar_lea.vmem %s157_s29, 4608  ;;  %p2969_p9 = scmp.lt.s32.totalorder %s157_s29, %s157_s29 }
  0x1f   : > { %p2962_p7 = scmp.ne.s32.totalorder %s157_s29, %s2961_s12  ;;  %p2970_p6 = scmp.lt.s32.totalorder %s2961_s12, %s2961_s12 }
  0x21   : > { %p2964_p8 = pnand %p2962_p7, %p2950_p0  ;;  %p2971_p5 = por %p2970_p6, %p2969_p9 }
  0x23   : > { %p2965_p11 = pneg %p2964_p8 }
  0x25   : > { %p2972_p10 = pnand %p2971_p5, %p2965_p11 }
  0x27   : > { %2975 = shalt.err (!%p2972_p10)
}
  0x28   : > { %s3045_s13 = smov 64   ;;  %s3046_s14 = smov 4  }
  0x29   : > { %2856 = dma.hbm_to_vmem [thread:$0]  (!%p3133_p12), %s3539_s3, 4608, %s157_s29, [#allocation3], %s3045_s13, %s3045_s13, %s3046_s14  }
  0x2a   : > { %p3548_p13 = scmp.ne.s32.totalorder %s3546_s27, 0 }
  0x2b   : > { %p3549_p1 = scmp.eq.s32.totalorder (!%p3548_p13), %s3097_s19, 0 }
  0x2c   : > { %181 = sbr.rel (%p3548_p13) target bundleno = 2475 (0x9ab), region = 36 }
  0x33   : > { %3021 = dma.done.wait (%p3549_p1), [#allocation3], 4608   ;;  %p3550_p0 = pmov %p3549_p1 }
  0x34   : > { %v3047_v0 = vmov 1   ;;  %v3048_v1 = vmov 0   ;;  %v220_v2 = vld [vmem:[%s3537_s1 + $0x10] sm:$0xff]  ;;  %v218_v3 = vld [vmem:[%s3537_s1] sm:$0xff]  ;;  %v219_v5 = vld [vmem:[%s3537_s1 + $0x8] sm:$0xff]  ;;  %s2730_s20 = sshll.u32 %s3097_s19, 2  ;;  %v267_v20 = vlaneseq }
  0x35   : > { %3023 = vsyncadd (%p3550_p0), [#allocation3], 4294962688  ;;  %2904 = vset.pattern.permute.xlu0 %v3047_v0  ;;  %2902 = vset.pattern.permute.xlu1 %v3047_v0  ;;  %v222_v4 = vld [vmem:[%s3537_s1 + $0x20] sm:$0xff]  ;;  %v224_v6 = vld [vmem:[%s3537_s1 + $0x30] sm:$0xff]  ;;  %p208_p5 = scmp.lt.s32.totalorder %s2730_s20, 7  ;;  %vm592_vm0 = vcmask 523264  }
  0x36   : > { %637 = vmatprep.mubr.bf16.mxu0 %v3048_v1  ;;  %710 = vmatprep.mubr.bf16.mxu1 %v3048_v1  ;;  %v221_v7 = vld [vmem:[%s3537_s1 + $0x18] sm:$0xff]  ;;  %v436_v8 = vld [vmem:[%s3538_s2] sm:$0xff]  ;;  %v437_v9 = vld [vmem:[%s3538_s2 + $0x8] sm:$0xff]  ;;  %v3220_v23 = vshrl.u32 %v267_v20, 7  ;;  %s204_s29 = sand.u32 1, %s3034_s16   ;;  %s2846_s5 = sshll.u32 %s3097_s19, 6 }
  0x37   : > { %328 = vperm.xlu0 %2904, %v220_v2   ;;  %320 = vperm.xlu1 %2902, %v218_v3   ;;  %v223_v10 = vld [vmem:[%s3537_s1 + $0x28] sm:$0xff]  ;;  %v439_v11 = vld [vmem:[%s3538_s2 + $0x18] sm:$0xff]  ;;  %v438_v13 = vld [vmem:[%s3538_s2 + $0x10] sm:$0xff]  ;;  %s3558_s20 = smov (!%p208_p5, %s2730_s20), 7  ;;  %s2729_s30 = sshll.u32 %s204_s29, 2  ;;  %vm2634_vm1 = vcmp.lt.s32.totalorder %v267_v20, 512 }
  0x38   : > { %v441_v12 = vld [vmem:[%s3538_s2 + $0x28] sm:$0xff]  ;;  %v225_v14 = vld [vmem:[%s3537_s1 + $0x38] sm:$0xff]  ;;  %v440_v15 = vld [vmem:[%s3538_s2 + $0x20] sm:$0xff]  ;;  %s2731_s22 = sshll.u32 %s3558_s20, 1  ;;  %v269_v26 = vsub.s32 0, %v3220_v23  ;;  %v273_v27 = vsub.s32 1, %v3220_v23  ;;  %s3492_s10 = scalar_lea.hbm %s3540_s4, %s2846_s5 }
  0x39   : > { %v442_v16 = vld [vmem:[%s3538_s2 + $0x30] sm:$0xff]  ;;  %v443_v17 = vld [vmem:[%s3538_s2 + $0x38] sm:$0xff]  ;;  %s211_s27 = scalar_lea.vmem %s3536_s0, %s2731_s22  ;;  %v277_v28 = vsub.s32 2, %v3220_v23  ;;  %v281_v29 = vsub.s32 3, %v3220_v23  ;;  %s206_s6 = scalar_lea.vmem [#allocation5], %s2729_s30 }
  0x3a   : > { %v2732_v30 = vld [vmem:[%s211_s27 + $0x1] ss:$2 sm:$0xf]  ;;  %v215_v31 = vld [vmem:[%s211_s27] ss:$2 sm:$0xf] }
  0x3b   : > { %336 = vperm.xlu0 %2904, %v222_v4   ;;  %324 = vperm.xlu1 %2902, %v219_v5   ;;  %v3233_v34 = vrot.slane %v2732_v30, %v273_v27  ;;  %v3235_v35 = vrot.slane %v2732_v30, %v281_v29  ;;  %v3237_v36 = vrot.slane %v215_v31, %v273_v27  ;;  %s2652_s7 = sshll.u32 %s206_s6, 4  ;;  %s2638_s19 = scalar_lea.sflag [#allocation4], %s204_s29  ;;  %s3494_s7 = int_to_ptr.vmem [resolvable:$true] %s2652_s7 }
  0x3c   : > { %v3239_v37 = vrot.slane %v215_v31, %v281_v29  ;;  %v3241_v38 = vrot.slane %v2732_v30, %v269_v26  ;;  %v3243_v39 = vrot.slane %v2732_v30, %v277_v28  ;;  %v3245_v40 = vrot.slane %v215_v31, %v269_v26  ;;  %s2976_s11 = scalar_lea.vmem %s3494_s7, 64  ;;  %p3551_p9 = scmp.ne.s32.totalorder %s3544_s25, 0 }
  0x3d   : > { %v3247_v41 = vrot.slane %v215_v31, %v277_v28  ;;  %p2977_p6 = scmp.ne.s32.totalorder %s3494_s7, %s2976_s11  ;;  %s3050_s12 = smov [#allocation5]  }
  0x3e   : > { %s2980_s13 = sshll.u32 %s3050_s12, 4  ;;  %s2981_s13 = int_to_ptr.vmem [resolvable:$false] %s2980_s13 }
  0x3f   : > { %344 = vperm.xlu0 %2904, %v224_v6   ;;  %2903 = vset.pattern.permute.xlu1 %v3048_v1  ;;  %p2978_p10 = pnand %p2977_p6, %p3551_p9  ;;  %s2982_s14 = scalar_lea.vmem %s2981_s13, 128 }
  0x40   : > { %243 = vperm.xlu1 %2903, %v221_v7   ;;  %p2983_p2 = scmp.lt.s32.totalorder %s3494_s7, %s2981_s13  ;;  %p2984_p3 = scmp.lt.s32.totalorder %s2982_s14, %s2976_s11 }
  0x41   : > { %p2979_p12 = pneg %p2978_p10 }
  0x42   : > { %p2985_p4 = por %p2984_p3, %p2983_p2 }
  0x43   : > { %2909 = vset.pattern.permute.xlu0 %v3048_v1 }
  0x44   : > { %228 = vperm.xlu0 %2909, %v218_v3   ;;  %2905 = vset.pattern.permute.xlu1 %v3047_v0  ;;  %p2986_p7 = pnand %p2985_p4, %p2979_p12 }
  0x45   : > { %332 = vperm.xlu1 %2905, %v221_v7  }
  0x48   : > { %233 = vperm.xlu0 %2909, %v219_v5  }
  0x49   : > { %2906 = vset.pattern.permute.xlu1 %v3048_v1 }
  0x4a   : > { %446 = vperm.xlu1 %2906, %v436_v8  }
  0x4c   : > { %238 = vperm.xlu0 %2909, %v220_v2  }
  0x4e   : > { %248 = vperm.xlu1 %2906, %v222_v4  }
  0x50   : > { %451 = vperm.xlu0 %2909, %v437_v9  }
  0x52   : > { %253 = vperm.xlu1 %2906, %v223_v10  }
  0x54   : > { %461 = vperm.xlu0 %2909, %v439_v11  }
  0x56   : > { %2907 = vset.pattern.permute.xlu1 %v3047_v0 }
  0x57   : > { %340 = vperm.xlu1 %2907, %v223_v10  }
  0x58   : > { %471 = vperm.xlu0 %2909, %v441_v12  }
  0x5b   : > { %2908 = vset.pattern.permute.xlu1 %v3048_v1 }
  0x5c   : > { %456 = vperm.xlu1 %2908, %v438_v13  }
  0x60   : > { %258 = vperm.xlu1 %2908, %v224_v6  }
  0x64   : > { %263 = vperm.xlu1 %2908, %v225_v14  }
  0x68   : > { %2910 = vset.pattern.permute.xlu1 %v3047_v0 }
  0x69   : > { %348 = vperm.xlu1 %2910, %v225_v14  }
  0x6d   : > { %2911 = vset.pattern.permute.xlu1 %v3048_v1 }
  0x6e   : > { %466 = vperm.xlu1 %2911, %v440_v15  }
  0x72   : > { %476 = vperm.xlu1 %2911, %v442_v16  }
  0x76   : > { %481 = vperm.xlu1 %2911, %v443_v17  }
  0xb6   : > { %v321_v18 = vpop.permute.xlu1 %320  ;;  %v3215_v19 = vpop.permute.xlu0 %328 }
  0xb7   : > { %v373_v47 = vmul.f32 %v3233_v34, %v321_v18  ;;  %v375_v48 = vmul.f32 %v3235_v35, %v321_v18  ;;  %v372_v52 = vmul.f32 %v3241_v38, %v321_v18  ;;  %v374_v53 = vmul.f32 %v3243_v39, %v321_v18 }
  0xb8   : > { %v380_v16 = vmul.f32 %v3241_v38, %v3215_v19  ;;  %v381_v17 = vmul.f32 %v3233_v34, %v3215_v19  ;;  %v382_v18 = vmul.f32 %v3243_v39, %v3215_v19 }
  0xba   : > { %v325_v21 = vpop.permute.xlu1 %324  ;;  %v3217_v22 = vpop.permute.xlu0 %336 }
  0xbb   : > { %v377_v56 = vmul.f32 %v3233_v34, %v325_v21  ;;  %v379_v57 = vmul.f32 %v3235_v35, %v325_v21  ;;  %v376_v61 = vmul.f32 %v3241_v38, %v325_v21  ;;  %v378_v62 = vmul.f32 %v3243_v39, %v325_v21 }
  0xbc   : > { %v383_v21 = vmul.f32 %v3235_v35, %v3215_v19 }
  0xbe   : > { %v3222_v24 = vpop.permute.xlu0 %344 }
  0xbf   : > { %v3227_v25 = vpop.permute.xlu1 %243 }
  0xc3   : > { %v229_v32 = vpop.permute.xlu0 %228 }
  0xc4   : > { %v333_v33 = vpop.permute.xlu1 %332  ;;  %v288_v42 = vmul.f32 %v3237_v36, %v229_v32  ;;  %v290_v43 = vmul.f32 %v3239_v37, %v229_v32  ;;  %v287_v45 = vmul.f32 %v3245_v40, %v229_v32  ;;  %v289_v46 = vmul.f32 %v3247_v41, %v229_v32 }
  0xc6   : > { %v405_v59 = vadd.f32 %v373_v47, %v288_v42  ;;  %v407_v60 = vadd.f32 %v375_v48, %v290_v43  ;;  %v404_v63 = vadd.f32 %v372_v52, %v287_v45  ;;  %v406_v0 = vadd.f32 %v374_v53, %v289_v46 }
  0xc7   : > { %v234_v44 = vpop.permute.xlu0 %233  ;;  %v385_v45 = vmul.f32 %v3233_v34, %v333_v33  ;;  %v386_v46 = vmul.f32 %v3243_v39, %v333_v33  ;;  %v387_v47 = vmul.f32 %v3235_v35, %v333_v33 }
  0xc8   : > { %v292_v49 = vmul.f32 %v3237_v36, %v234_v44  ;;  %v294_v50 = vmul.f32 %v3239_v37, %v234_v44  ;;  %v291_v54 = vmul.f32 %v3245_v40, %v234_v44  ;;  %v293_v55 = vmul.f32 %v3247_v41, %v234_v44 }
  0xc9   : > { %v447_v51 = vpop.permute.xlu1 %446  ;;  %v384_v44 = vmul.f32 %v3241_v38, %v333_v33  ;;  %v301_v33 = vmul.f32 %v3247_v41, %v3227_v25 }
  0xca   : > { %v409_v3 = vadd.f32 %v377_v56, %v292_v49  ;;  %v485_v4 = vadd.f32 %v447_v51, %v405_v59  ;;  %v411_v5 = vadd.f32 %v379_v57, %v294_v50  ;;  %v487_v6 = vadd.f32 %v447_v51, %v407_v60 }
  0xcb   : > { %v239_v58 = vpop.permute.xlu0 %238  ;;  %v408_v7 = vadd.f32 %v376_v61, %v291_v54  ;;  %v484_v8 = vadd.f32 %v447_v51, %v404_v63  ;;  %v410_v9 = vadd.f32 %v378_v62, %v293_v55  ;;  %v486_v10 = vadd.f32 %v447_v51, %v406_v0 }
  0xcc   : > { %v517_v27 = vmax.f32 %v485_v4, 0.0  ;;  %v519_v28 = vmax.f32 %v487_v6, 0.0  ;;  %v295_v51 = vmul.f32 %v3245_v40, %v239_v58  ;;  %v296_v52 = vmul.f32 %v3237_v36, %v239_v58 }
  0xcd   : > { %v3265_v2 = vpop.permute.xlu1 %248  ;;  %v516_v29 = vmax.f32 %v484_v8, 0.0  ;;  %v518_v30 = vmax.f32 %v486_v10, 0.0  ;;  %v297_v53 = vmul.f32 %v3247_v41, %v239_v58  ;;  %v298_v54 = vmul.f32 %v3239_v37, %v239_v58 }
  0xce   : > { %v299_v56 = vmul.f32 %v3245_v40, %v3227_v25  ;;  %v300_v57 = vmul.f32 %v3237_v36, %v3227_v25  ;;  %v302_v59 = vmul.f32 %v3239_v37, %v3227_v25  ;;  %v418_v58 = vadd.f32 %v386_v46, %v301_v33 }
  0xcf   : > { %v452_v11 = vpop.permute.xlu0 %451  ;;  %v412_v0 = vadd.f32 %v380_v16, %v295_v51  ;;  %v414_v4 = vadd.f32 %v382_v18, %v297_v53  ;;  %v390_v33 = vmul.f32 %v3243_v39, %v3217_v22 }
  0xd0   : > { %v489_v12 = vadd.f32 %v452_v11, %v409_v3  ;;  %v491_v13 = vadd.f32 %v452_v11, %v411_v5  ;;  %v488_v14 = vadd.f32 %v452_v11, %v408_v7  ;;  %v490_v15 = vadd.f32 %v452_v11, %v410_v9 }
  0xd1   : > { %v3275_v26 = vpop.permute.xlu1 %253  ;;  %v416_v61 = vadd.f32 %v384_v44, %v299_v56  ;;  %v417_v62 = vadd.f32 %v385_v45, %v300_v57  ;;  %v419_v63 = vadd.f32 %v387_v47, %v302_v59  ;;  %v413_v3 = vadd.f32 %v381_v17, %v296_v52 }
  0xd2   : > { %v521_v31 = vmax.f32 %v489_v12, 0.0  ;;  %v523_v32 = vmax.f32 %v491_v13, 0.0  ;;  %v520_v42 = vmax.f32 %v488_v14, 0.0  ;;  %v522_v43 = vmax.f32 %v490_v15, 0.0 }
  0xd3   : > { %v462_v60 = vpop.permute.xlu0 %461  ;;  %v415_v5 = vadd.f32 %v383_v21, %v298_v54  ;;  %v307_v47 = vmul.f32 %v3245_v40, %v3275_v26  ;;  %v388_v56 = vmul.f32 %v3241_v38, %v3217_v22  ;;  %v389_v57 = vmul.f32 %v3233_v34, %v3217_v22 }
  0xd4   : > { %v549_v48 = vpack.c.bf16 %v521_v31, %v517_v27  ;;  %v551_v19 = vpack.c.bf16 %v523_v32, %v519_v28  ;;  %v548_v49 = vpack.c.bf16 %v520_v42, %v516_v29  ;;  %v550_v50 = vpack.c.bf16 %v522_v43, %v518_v30 }
  0xd5   : > { %v496_v6 = vadd.f32 %v462_v60, %v416_v61  ;;  %v497_v7 = vadd.f32 %v462_v60, %v417_v62  ;;  %v498_v8 = vadd.f32 %v462_v60, %v418_v58  ;;  %v499_v9 = vadd.f32 %v462_v60, %v419_v63 }
  0xd6   : > { %v341_v55 = vpop.permute.xlu1 %340  ;;  %605 = vmatprep.subr.bf16.mxu0 %v549_v48  ;;  %678 = vmatprep.subr.bf16.mxu1 %v551_v19  ;;  %v308_v48 = vmul.f32 %v3237_v36, %v3275_v26  ;;  %v309_v19 = vmul.f32 %v3247_v41, %v3275_v26  ;;  %v303_v59 = vmul.f32 %v3245_v40, %v3265_v2 }
  0xd7   : > { %606 = vmatpush1.bf16.msra.mxu0 %v548_v49  ;;  %679 = vmatpush1.bf16.msra.mxu1 %v550_v50  ;;  %v529_v30 = vmax.f32 %v497_v7, 0.0  ;;  %v531_v31 = vmax.f32 %v499_v9, 0.0  ;;  %v528_v16 = vmax.f32 %v496_v6, 0.0  ;;  %v530_v17 = vmax.f32 %v498_v8, 0.0 }
  0xd8   : > { %v392_v18 = vmul.f32 %v3241_v38, %v341_v55  ;;  %v393_v21 = vmul.f32 %v3233_v34, %v341_v55  ;;  %v394_v32 = vmul.f32 %v3243_v39, %v341_v55  ;;  %v395_v42 = vmul.f32 %v3235_v35, %v341_v55  ;;  %v472_v55 = vpop.permute.xlu0 %471 }
  0xd9   : > { %v310_v49 = vmul.f32 %v3239_v37, %v3275_v26  ;;  %v391_v26 = vmul.f32 %v3235_v35, %v3217_v22  ;;  %v304_v60 = vmul.f32 %v3237_v36, %v3265_v2  ;;  %v305_v61 = vmul.f32 %v3247_v41, %v3265_v2 }
  0xda   : > { %v424_v51 = vadd.f32 %v392_v18, %v307_v47  ;;  %v425_v52 = vadd.f32 %v393_v21, %v308_v48  ;;  %v426_v53 = vadd.f32 %v394_v32, %v309_v19  ;;  %v306_v62 = vmul.f32 %v3239_v37, %v3265_v2 }
  0xdb   : > { %v457_v10 = vpop.permute.xlu1 %456  ;;  %v427_v54 = vadd.f32 %v395_v42, %v310_v49  ;;  %v396_v8 = vmul.f32 %v3241_v38, %v3222_v24  ;;  %v397_v9 = vmul.f32 %v3233_v34, %v3222_v24  ;;  %v398_v2 = vmul.f32 %v3243_v39, %v3222_v24 }
  0xdc   : > { %v492_v11 = vadd.f32 %v457_v10, %v412_v0  ;;  %v493_v25 = vadd.f32 %v457_v10, %v413_v3  ;;  %v494_v12 = vadd.f32 %v457_v10, %v414_v4  ;;  %v495_v13 = vadd.f32 %v457_v10, %v415_v5 }
  0xdd   : > { %v504_v58 = vadd.f32 %v472_v55, %v424_v51  ;;  %v505_v63 = vadd.f32 %v472_v55, %v425_v52  ;;  %v506_v0 = vadd.f32 %v472_v55, %v426_v53  ;;  %v507_v3 = vadd.f32 %v472_v55, %v427_v54 }
  0xde   : > { %v525_v14 = vmax.f32 %v493_v25, 0.0  ;;  %v527_v15 = vmax.f32 %v495_v13, 0.0  ;;  %v524_v27 = vmax.f32 %v492_v11, 0.0  ;;  %v526_v28 = vmax.f32 %v494_v12, 0.0 }
  0xdf   : > { %v259_v29 = vpop.permute.xlu1 %258  ;;  %v399_v10 = vmul.f32 %v3235_v35, %v3222_v24  ;;  %v420_v11 = vadd.f32 %v388_v56, %v303_v59  ;;  %v421_v25 = vadd.f32 %v389_v57, %v304_v60  ;;  %v422_v12 = vadd.f32 %v390_v33, %v305_v61 }
  0xe0   : > { %v553_v43 = vpack.c.bf16 %v529_v30, %v525_v14  ;;  %v555_v44 = vpack.c.bf16 %v531_v31, %v527_v15  ;;  %v552_v45 = vpack.c.bf16 %v528_v16, %v524_v27  ;;  %v554_v46 = vpack.c.bf16 %v530_v17, %v526_v28 }
  0xe1   : > { %v311_v5 = vmul.f32 %v3245_v40, %v259_v29  ;;  %v312_v22 = vmul.f32 %v3237_v36, %v259_v29  ;;  %v313_v6 = vmul.f32 %v3247_v41, %v259_v29  ;;  %v314_v7 = vmul.f32 %v3239_v37, %v259_v29 }
  0xe2   : > { %607 = vmatprep.subr.bf16.mxu0 %v553_v43  ;;  %680 = vmatprep.subr.bf16.mxu1 %v555_v44  ;;  %v423_v13 = vadd.f32 %v391_v26, %v306_v62  ;;  %v536_v14 = vmax.f32 %v504_v58, 0.0  ;;  %v537_v15 = vmax.f32 %v505_v63, 0.0  ;;  %v538_v27 = vmax.f32 %v506_v0, 0.0 }
  0xe3   : > { %v264_v50 = vpop.permute.xlu1 %263  ;;  %608 = vmatpush1.bf16.msra.mxu0 %v552_v45  ;;  %681 = vmatpush1.bf16.msra.mxu1 %v554_v46  ;;  %v539_v28 = vmax.f32 %v507_v3, 0.0  ;;  %v428_v30 = vadd.f32 %v396_v8, %v311_v5  ;;  %v429_v31 = vadd.f32 %v397_v9, %v312_v22  ;;  %v430_v16 = vadd.f32 %v398_v2, %v313_v6  ;;  %v2912_v2 = vld [vmem:[#allocation2] sm:$0xff]  }
  0xe4   : > { %v431_v17 = vadd.f32 %v399_v10, %v314_v7  ;;  %v315_v49 = vmul.f32 %v3245_v40, %v264_v50  ;;  %v316_v51 = vmul.f32 %v3237_v36, %v264_v50  ;;  %v317_v52 = vmul.f32 %v3247_v41, %v264_v50  ;;  %v2913_v10 = vld [vmem:[#allocation2 + $0x8] sm:$0xff]  }
  0xe5   : > { %v318_v53 = vmul.f32 %v3239_v37, %v264_v50 }
  0xe8   : > { %v349_v4 = vpop.permute.xlu1 %348 }
  0xe9   : > { %v400_v43 = vmul.f32 %v3241_v38, %v349_v4  ;;  %v401_v24 = vmul.f32 %v3233_v34, %v349_v4  ;;  %v402_v44 = vmul.f32 %v3243_v39, %v349_v4  ;;  %v403_v45 = vmul.f32 %v3235_v35, %v349_v4 }
  0xeb   : > { %v432_v26 = vadd.f32 %v400_v43, %v315_v49  ;;  %v433_v59 = vadd.f32 %v401_v24, %v316_v51  ;;  %v434_v60 = vadd.f32 %v402_v44, %v317_v52  ;;  %v435_v61 = vadd.f32 %v403_v45, %v318_v53 }
  0xed   : > { %v467_v29 = vpop.permute.xlu1 %466 }
  0xee   : > { %v500_v18 = vadd.f32 %v467_v29, %v420_v11  ;;  %v501_v21 = vadd.f32 %v467_v29, %v421_v25  ;;  %v502_v32 = vadd.f32 %v467_v29, %v422_v12  ;;  %v503_v42 = vadd.f32 %v467_v29, %v423_v13  ;;  %v2914_v11 = vld [vmem:[#allocation2 + $0x10] sm:$0xff]   ;;  %v2915_v25 = vld [vmem:[#allocation2 + $0x18] sm:$0xff]  }
  0xf0   : > { %v533_v46 = vmax.f32 %v501_v21, 0.0  ;;  %v535_v47 = vmax.f32 %v503_v42, 0.0  ;;  %v532_v48 = vmax.f32 %v500_v18, 0.0  ;;  %v534_v19 = vmax.f32 %v502_v32, 0.0 }
  0xf1   : > { %v477_v54 = vpop.permute.xlu1 %476 }
  0xf2   : > { %v508_v38 = vadd.f32 %v477_v54, %v428_v30  ;;  %v509_v55 = vadd.f32 %v477_v54, %v429_v31  ;;  %v510_v34 = vadd.f32 %v477_v54, %v430_v16  ;;  %v511_v56 = vadd.f32 %v477_v54, %v431_v17 }
  0xf3   : > { %v557_v39 = vpack.c.bf16 %v537_v15, %v533_v46  ;;  %v559_v57 = vpack.c.bf16 %v539_v28, %v535_v47  ;;  %v556_v35 = vpack.c.bf16 %v536_v14, %v532_v48  ;;  %v558_v33 = vpack.c.bf16 %v538_v27, %v534_v19 }
  0xf4   : > { %v541_v50 = vmax.f32 %v509_v55, 0.0  ;;  %v543_v58 = vmax.f32 %v511_v56, 0.0  ;;  %v540_v63 = vmax.f32 %v508_v38, 0.0  ;;  %v542_v0 = vmax.f32 %v510_v34, 0.0 }
  0xf5   : > { %609 = vmatprep.subr.bf16.mxu0 %v557_v39  ;;  %682 = vmatprep.subr.bf16.mxu1 %v559_v57  ;;  %v482_v36 = vpop.permute.xlu1 %481 }
  0xf6   : > { %v512_v40 = vadd.f32 %v482_v36, %v432_v26  ;;  %v513_v41 = vadd.f32 %v482_v36, %v433_v59  ;;  %v514_v62 = vadd.f32 %v482_v36, %v434_v60  ;;  %v515_v37 = vadd.f32 %v482_v36, %v435_v61  ;;  %610 = vmatpush1.bf16.msra.mxu0 %v556_v35 }
  0xf7   : > { %683 = vmatpush1.bf16.msra.mxu1 %v558_v33 }
  0xf8   : > { %v544_v3 = vmax.f32 %v512_v40, 0.0  ;;  %v545_v4 = vmax.f32 %v513_v41, 0.0  ;;  %v546_v5 = vmax.f32 %v514_v62, 0.0  ;;  %v547_v22 = vmax.f32 %v515_v37, 0.0 }
  0xfa   : > { %v561_v6 = vpack.c.bf16 %v545_v4, %v541_v50  ;;  %v563_v7 = vpack.c.bf16 %v547_v22, %v543_v58  ;;  %v560_v8 = vpack.c.bf16 %v544_v3, %v540_v63  ;;  %v562_v9 = vpack.c.bf16 %v546_v5, %v542_v0 }
  0xfc   : > { %611 = vmatprep.subr.bf16.mxu0 %v561_v6  ;;  %684 = vmatprep.subr.bf16.mxu1 %v563_v7 }
  0xfd   : > { %612 = vmatpush1.bf16.msra.mxu0 %v560_v8  ;;  %685 = vmatpush1.bf16.msra.mxu1 %v562_v9 }
 0x100   : > { %2737 = vmatmul.mubr.msk.bf16.vlgmr.msra.gmra.mrb[0].mxu0 %vm592_vm0, %v2912_v2  ;;  %2741 = vmatmul.mubr.msk.bf16.vlgmr.msra.gmra.mrb[0].mxu1 %vm592_vm0, %v2912_v2 }
 0x101   : > { %647 = vmatprep.mubr.bf16.mxu0 %v3048_v1  ;;  %720 = vmatprep.mubr.bf16.mxu1 %v3048_v1 }
 0x108   : > { %2738 = vmatmul.mubr.msk.bf16.gmra.mrb[4].mxu0 %vm592_vm0, %v2913_v10  ;;  %2742 = vmatmul.mubr.msk.bf16.gmra.mrb[4].mxu1 %vm592_vm0, %v2913_v10 }
 0x109   : > { %657 = vmatprep.mubr.bf16.mxu0 %v3048_v1  ;;  %730 = vmatprep.mubr.bf16.mxu1 %v3048_v1 }
 0x110   : > { %2739 = vmatmul.mubr.msk.bf16.gmra.mrb[8].mxu0 %vm592_vm0, %v2914_v11  ;;  %2743 = vmatmul.mubr.msk.bf16.gmra.mrb[8].mxu1 %vm592_vm0, %v2914_v11 }
 0x111   : > { %667 = vmatprep.mubr.bf16.mxu0 %v3048_v1  ;;  %740 = vmatprep.mubr.bf16.mxu1 %v3048_v1 }
 0x118   : > { %2740 = vmatmul.mubr.msk.bf16.gmra.mrb[12].mxu0 %vm592_vm0, %v2915_v25  ;;  %2744 = vmatmul.mubr.msk.bf16.gmra.mrb[12].mxu1 %vm592_vm0, %v2915_v25 }
 0x119   : > { %872 = vmatprep.mubr.bf16.mxu0 %v3048_v1  ;;  %945 = vmatprep.mubr.bf16.mxu1 %v3048_v1 }
 0x1d3   : > { %v639_v12 = vpop.f32.mrb[0].mxu0  ;;  %v712_v13 = vpop.f32.mrb[0].mxu1 }
 0x1d4   : > { %v641_v14 = vpop.f32.mrb[1].mxu0  ;;  %v714_v15 = vpop.f32.mrb[1].mxu1  ;;  %v751_v29 = vmax.f32 %v639_v12, 0.0  ;;  %v753_v30 = vmax.f32 %v712_v13, 0.0 }
 0x1d5   : > { %v643_v27 = vpop.f32.mrb[2].mxu0  ;;  %v716_v28 = vpop.f32.mrb[2].mxu1  ;;  %v752_v21 = vmax.f32 %v641_v14, 0.0  ;;  %v754_v32 = vmax.f32 %v714_v15, 0.0 }
 0x1d6   : > { %v755_v31 = vmax.f32 %v643_v27, 0.0  ;;  %v757_v16 = vmax.f32 %v716_v28, 0.0  ;;  %v645_v17 = vpop.f32.mrb[3].mxu0  ;;  %v718_v18 = vpop.f32.mrb[3].mxu1 }
 0x1d7   : > { %v756_v42 = vmax.f32 %v645_v17, 0.0  ;;  %v758_v43 = vmax.f32 %v718_v18, 0.0 }
 0x1d8   : > { %v783_v24 = vpack.c.bf16 %v755_v31, %v751_v29  ;;  %v785_v44 = vpack.c.bf16 %v757_v16, %v753_v30 }
 0x1d9   : > { %v784_v45 = vpack.c.bf16 %v756_v42, %v752_v21  ;;  %v786_v46 = vpack.c.bf16 %v758_v43, %v754_v32 }
 0x1db   : > { %v649_v47 = vpop.f32.mrb[4].mxu0  ;;  %v722_v48 = vpop.f32.mrb[4].mxu1  ;;  %840 = vmatprep.subr.bf16.mxu0 %v784_v45  ;;  %913 = vmatprep.subr.bf16.mxu1 %v786_v46  ;;  %v2916_v46 = vld [vmem:[#allocation2 + $0x20] sm:$0xff]  }
 0x1dc   : > { %v651_v19 = vpop.f32.mrb[5].mxu0  ;;  %v724_v49 = vpop.f32.mrb[5].mxu1  ;;  %841 = vmatpush1.bf16.msra.mxu0 %v783_v24  ;;  %914 = vmatpush1.bf16.msra.mxu1 %v785_v44  ;;  %v759_v53 = vmax.f32 %v649_v47, 0.0  ;;  %v761_v54 = vmax.f32 %v722_v48, 0.0  ;;  %v2917_v47 = vld [vmem:[#allocation2 + $0x28] sm:$0xff]   ;;  %v2918_v48 = vld [vmem:[#allocation2 + $0x30] sm:$0xff]  }
 0x1dd   : > { %v653_v51 = vpop.f32.mrb[6].mxu0  ;;  %v726_v52 = vpop.f32.mrb[6].mxu1  ;;  %v760_v39 = vmax.f32 %v651_v19, 0.0  ;;  %v762_v57 = vmax.f32 %v724_v49, 0.0  ;;  %v2919_v19 = vld [vmem:[#allocation2 + $0x38] sm:$0xff]  }
 0x1de   : > { %v763_v38 = vmax.f32 %v653_v51, 0.0  ;;  %v765_v55 = vmax.f32 %v726_v52, 0.0  ;;  %v655_v34 = vpop.f32.mrb[7].mxu0  ;;  %v728_v56 = vpop.f32.mrb[7].mxu1 }
 0x1df   : > { %v764_v35 = vmax.f32 %v655_v34, 0.0  ;;  %v766_v33 = vmax.f32 %v728_v56, 0.0 }
 0x1e0   : > { %v787_v26 = vpack.c.bf16 %v763_v38, %v759_v53  ;;  %v789_v59 = vpack.c.bf16 %v765_v55, %v761_v54 }
 0x1e1   : > { %v788_v60 = vpack.c.bf16 %v764_v35, %v760_v39  ;;  %v790_v61 = vpack.c.bf16 %v766_v33, %v762_v57 }
 0x1e3   : > { %v659_v36 = vpop.f32.mrb[8].mxu0  ;;  %v732_v40 = vpop.f32.mrb[8].mxu1  ;;  %842 = vmatprep.subr.bf16.mxu0 %v788_v60  ;;  %915 = vmatprep.subr.bf16.mxu1 %v790_v61 }
 0x1e4   : > { %v661_v41 = vpop.f32.mrb[9].mxu0  ;;  %v734_v62 = vpop.f32.mrb[9].mxu1  ;;  %843 = vmatpush1.bf16.msra.mxu0 %v787_v26  ;;  %916 = vmatpush1.bf16.msra.mxu1 %v789_v59  ;;  %v767_v58 = vmax.f32 %v659_v36, 0.0  ;;  %v769_v63 = vmax.f32 %v732_v40, 0.0 }
 0x1e5   : > { %v663_v37 = vpop.f32.mrb[10].mxu0  ;;  %v736_v50 = vpop.f32.mrb[10].mxu1  ;;  %v768_v22 = vmax.f32 %v661_v41, 0.0  ;;  %v770_v6 = vmax.f32 %v734_v62, 0.0 }
 0x1e6   : > { %v771_v0 = vmax.f32 %v663_v37, 0.0  ;;  %v773_v3 = vmax.f32 %v736_v50, 0.0  ;;  %v665_v4 = vpop.f32.mrb[11].mxu0  ;;  %v738_v5 = vpop.f32.mrb[11].mxu1 }
 0x1e7   : > { %v772_v7 = vmax.f32 %v665_v4, 0.0  ;;  %v774_v8 = vmax.f32 %v738_v5, 0.0 }
 0x1e8   : > { %v791_v9 = vpack.c.bf16 %v771_v0, %v767_v58  ;;  %v793_v2 = vpack.c.bf16 %v773_v3, %v769_v63 }
 0x1e9   : > { %v792_v10 = vpack.c.bf16 %v772_v7, %v768_v22  ;;  %v794_v11 = vpack.c.bf16 %v774_v8, %v770_v6 }
 0x1eb   : > { %v669_v25 = vpop.f32.mrb[12].mxu0  ;;  %v742_v12 = vpop.f32.mrb[12].mxu1  ;;  %844 = vmatprep.subr.bf16.mxu0 %v792_v10  ;;  %917 = vmatprep.subr.bf16.mxu1 %v794_v11 }
 0x1ec   : > { %v671_v13 = vpop.f32.mrb[13].mxu0  ;;  %v744_v14 = vpop.f32.mrb[13].mxu1  ;;  %845 = vmatpush1.bf16.msra.mxu0 %v791_v9  ;;  %918 = vmatpush1.bf16.msra.mxu1 %v793_v2  ;;  %v775_v28 = vmax.f32 %v669_v25, 0.0  ;;  %v777_v29 = vmax.f32 %v742_v12, 0.0 }
 0x1ed   : > { %v673_v15 = vpop.f32.mrb[14].mxu0  ;;  %v746_v27 = vpop.f32.mrb[14].mxu1  ;;  %v776_v18 = vmax.f32 %v671_v13, 0.0  ;;  %v778_v21 = vmax.f32 %v744_v14, 0.0 }
 0x1ee   : > { %v779_v30 = vmax.f32 %v673_v15, 0.0  ;;  %v781_v31 = vmax.f32 %v746_v27, 0.0  ;;  %v675_v16 = vpop.f32.mrb[15].mxu0  ;;  %v748_v17 = vpop.f32.mrb[15].mxu1 }
 0x1ef   : > { %v780_v32 = vmax.f32 %v675_v16, 0.0  ;;  %v782_v42 = vmax.f32 %v748_v17, 0.0 }
 0x1f0   : > { %v795_v43 = vpack.c.bf16 %v779_v30, %v775_v28  ;;  %v797_v24 = vpack.c.bf16 %v781_v31, %v777_v29 }
 0x1f1   : > { %v796_v44 = vpack.c.bf16 %v780_v32, %v776_v18  ;;  %v798_v45 = vpack.c.bf16 %v782_v42, %v778_v21 }
 0x1f3   : > { %846 = vmatprep.subr.bf16.mxu0 %v796_v44  ;;  %919 = vmatprep.subr.bf16.mxu1 %v798_v45 }
 0x1f4   : > { %847 = vmatpush1.bf16.msra.mxu0 %v795_v43  ;;  %920 = vmatpush1.bf16.msra.mxu1 %v797_v24 }
 0x1f7   : > { %2749 = vmatmul.mubr.msk.bf16.vlgmr.msra.gmra.mrb[16].mxu0 %vm592_vm0, %v2916_v46  ;;  %2753 = vmatmul.mubr.msk.bf16.vlgmr.msra.gmra.mrb[16].mxu1 %vm592_vm0, %v2916_v46 }
 0x1f8   : > { %882 = vmatprep.mubr.bf16.mxu0 %v3048_v1  ;;  %955 = vmatprep.mubr.bf16.mxu1 %v3048_v1 }
 0x1ff   : > { %2750 = vmatmul.mubr.msk.bf16.gmra.mrb[20].mxu0 %vm592_vm0, %v2917_v47  ;;  %2754 = vmatmul.mubr.msk.bf16.gmra.mrb[20].mxu1 %vm592_vm0, %v2917_v47 }
 0x200   : > { %892 = vmatprep.mubr.bf16.mxu0 %v3048_v1  ;;  %965 = vmatprep.mubr.bf16.mxu1 %v3048_v1 }
 0x207   : > { %2751 = vmatmul.mubr.msk.bf16.gmra.mrb[24].mxu0 %vm592_vm0, %v2918_v48  ;;  %2755 = vmatmul.mubr.msk.bf16.gmra.mrb[24].mxu1 %vm592_vm0, %v2918_v48 }
 0x208   : > { %902 = vmatprep.mubr.bf16.mxu0 %v3048_v1  ;;  %975 = vmatprep.mubr.bf16.mxu1 %v3048_v1 }
 0x20f   : > { %2752 = vmatmul.mubr.msk.bf16.gmra.mrb[28].mxu0 %vm592_vm0, %v2919_v19  ;;  %2756 = vmatmul.mubr.msk.bf16.gmra.mrb[28].mxu1 %vm592_vm0, %v2919_v19 }
 0x210   : > { %1107 = vmatprep.mubr.bf16.mxu0 %v3048_v1  ;;  %1180 = vmatprep.mubr.bf16.mxu1 %v3048_v1 }
 0x2ca   : > { %v874_v49 = vpop.f32.mrb[16].mxu0  ;;  %v947_v51 = vpop.f32.mrb[16].mxu1 }
 0x2cb   : > { %v876_v52 = vpop.f32.mrb[17].mxu0  ;;  %v949_v53 = vpop.f32.mrb[17].mxu1  ;;  %v986_v55 = vmax.f32 %v874_v49, 0.0  ;;  %v988_v34 = vmax.f32 %v947_v51, 0.0 }
 0x2cc   : > { %v878_v54 = vpop.f32.mrb[18].mxu0  ;;  %v951_v38 = vpop.f32.mrb[18].mxu1  ;;  %v987_v33 = vmax.f32 %v876_v52, 0.0  ;;  %v989_v26 = vmax.f32 %v949_v53, 0.0 }
 0x2cd   : > { %v990_v56 = vmax.f32 %v878_v54, 0.0  ;;  %v992_v39 = vmax.f32 %v951_v38, 0.0  ;;  %v880_v57 = vpop.f32.mrb[19].mxu0  ;;  %v953_v35 = vpop.f32.mrb[19].mxu1 }
 0x2ce   : > { %v991_v59 = vmax.f32 %v880_v57, 0.0  ;;  %v993_v60 = vmax.f32 %v953_v35, 0.0 }
 0x2cf   : > { %v1018_v61 = vpack.c.bf16 %v990_v56, %v986_v55  ;;  %v1020_v36 = vpack.c.bf16 %v992_v39, %v988_v34 }
 0x2d0   : > { %v1019_v40 = vpack.c.bf16 %v991_v59, %v987_v33  ;;  %v1021_v41 = vpack.c.bf16 %v993_v60, %v989_v26 }
 0x2d2   : > { %v884_v62 = vpop.f32.mrb[20].mxu0  ;;  %v957_v37 = vpop.f32.mrb[20].mxu1  ;;  %1075 = vmatprep.subr.bf16.mxu0 %v1019_v40  ;;  %1148 = vmatprep.subr.bf16.mxu1 %v1021_v41  ;;  %v2920_v41 = vld [vmem:[#allocation2 + $0x40] sm:$0xff]  }
 0x2d3   : > { %v886_v50 = vpop.f32.mrb[21].mxu0  ;;  %v959_v58 = vpop.f32.mrb[21].mxu1  ;;  %1076 = vmatpush1.bf16.msra.mxu0 %v1018_v61  ;;  %1149 = vmatpush1.bf16.msra.mxu1 %v1020_v36  ;;  %v994_v3 = vmax.f32 %v884_v62, 0.0  ;;  %v996_v4 = vmax.f32 %v957_v37, 0.0  ;;  %v2921_v62 = vld [vmem:[#allocation2 + $0x48] sm:$0xff]   ;;  %v2922_v37 = vld [vmem:[#allocation2 + $0x50] sm:$0xff]  }
 0x2d4   : > { %v888_v63 = vpop.f32.mrb[22].mxu0  ;;  %v961_v0 = vpop.f32.mrb[22].mxu1  ;;  %v995_v8 = vmax.f32 %v886_v50, 0.0  ;;  %v997_v9 = vmax.f32 %v959_v58, 0.0  ;;  %v2923_v50 = vld [vmem:[#allocation2 + $0x58] sm:$0xff]  }
 0x2d5   : > { %v998_v5 = vmax.f32 %v888_v63, 0.0  ;;  %v1000_v22 = vmax.f32 %v961_v0, 0.0  ;;  %v890_v6 = vpop.f32.mrb[23].mxu0  ;;  %v963_v7 = vpop.f32.mrb[23].mxu1 }
 0x2d6   : > { %v999_v2 = vmax.f32 %v890_v6, 0.0  ;;  %v1001_v10 = vmax.f32 %v963_v7, 0.0 }
 0x2d7   : > { %v1022_v11 = vpack.c.bf16 %v998_v5, %v994_v3  ;;  %v1024_v25 = vpack.c.bf16 %v1000_v22, %v996_v4 }
 0x2d8   : > { %v1023_v12 = vpack.c.bf16 %v999_v2, %v995_v8  ;;  %v1025_v13 = vpack.c.bf16 %v1001_v10, %v997_v9 }
 0x2da   : > { %v894_v14 = vpop.f32.mrb[24].mxu0  ;;  %v967_v15 = vpop.f32.mrb[24].mxu1  ;;  %1077 = vmatprep.subr.bf16.mxu0 %v1023_v12  ;;  %1150 = vmatprep.subr.bf16.mxu1 %v1025_v13 }
 0x2db   : > { %v896_v27 = vpop.f32.mrb[25].mxu0  ;;  %v969_v28 = vpop.f32.mrb[25].mxu1  ;;  %1078 = vmatpush1.bf16.msra.mxu0 %v1022_v11  ;;  %1151 = vmatpush1.bf16.msra.mxu1 %v1024_v25  ;;  %v1002_v31 = vmax.f32 %v894_v14, 0.0  ;;  %v1004_v16 = vmax.f32 %v967_v15, 0.0 }
 0x2dc   : > { %v898_v29 = vpop.f32.mrb[26].mxu0  ;;  %v971_v30 = vpop.f32.mrb[26].mxu1  ;;  %v1003_v42 = vmax.f32 %v896_v27, 0.0  ;;  %v1005_v43 = vmax.f32 %v969_v28, 0.0 }
 0x2dd   : > { %v1006_v17 = vmax.f32 %v898_v29, 0.0  ;;  %v1008_v18 = vmax.f32 %v971_v30, 0.0  ;;  %v900_v21 = vpop.f32.mrb[27].mxu0  ;;  %v973_v32 = vpop.f32.mrb[27].mxu1 }
 0x2de   : > { %v1007_v24 = vmax.f32 %v900_v21, 0.0  ;;  %v1009_v44 = vmax.f32 %v973_v32, 0.0 }
 0x2df   : > { %v1026_v45 = vpack.c.bf16 %v1006_v17, %v1002_v31  ;;  %v1028_v46 = vpack.c.bf16 %v1008_v18, %v1004_v16 }
 0x2e0   : > { %v1027_v47 = vpack.c.bf16 %v1007_v24, %v1003_v42  ;;  %v1029_v48 = vpack.c.bf16 %v1009_v44, %v1005_v43 }
 0x2e2   : > { %v904_v19 = vpop.f32.mrb[28].mxu0  ;;  %v977_v49 = vpop.f32.mrb[28].mxu1  ;;  %1079 = vmatprep.subr.bf16.mxu0 %v1027_v47  ;;  %1152 = vmatprep.subr.bf16.mxu1 %v1029_v48 }
 0x2e3   : > { %v906_v51 = vpop.f32.mrb[29].mxu0  ;;  %v979_v52 = vpop.f32.mrb[29].mxu1  ;;  %1080 = vmatpush1.bf16.msra.mxu0 %v1026_v45  ;;  %1153 = vmatpush1.bf16.msra.mxu1 %v1028_v46  ;;  %v1010_v38 = vmax.f32 %v904_v19, 0.0  ;;  %v1012_v55 = vmax.f32 %v977_v49, 0.0 }
 0x2e4   : > { %v908_v53 = vpop.f32.mrb[30].mxu0  ;;  %v981_v54 = vpop.f32.mrb[30].mxu1  ;;  %v1011_v35 = vmax.f32 %v906_v51, 0.0  ;;  %v1013_v33 = vmax.f32 %v979_v52, 0.0 }
 0x2e5   : > { %v1014_v34 = vmax.f32 %v908_v53, 0.0  ;;  %v1016_v56 = vmax.f32 %v981_v54, 0.0  ;;  %v910_v39 = vpop.f32.mrb[31].mxu0  ;;  %v983_v57 = vpop.f32.mrb[31].mxu1 }
 0x2e6   : > { %v1015_v26 = vmax.f32 %v910_v39, 0.0  ;;  %v1017_v59 = vmax.f32 %v983_v57, 0.0 }
 0x2e7   : > { %v1030_v60 = vpack.c.bf16 %v1014_v34, %v1010_v38  ;;  %v1032_v61 = vpack.c.bf16 %v1016_v56, %v1012_v55 }
 0x2e8   : > { %v1031_v36 = vpack.c.bf16 %v1015_v26, %v1011_v35  ;;  %v1033_v40 = vpack.c.bf16 %v1017_v59, %v1013_v33 }
 0x2ea   : > { %1081 = vmatprep.subr.bf16.mxu0 %v1031_v36  ;;  %1154 = vmatprep.subr.bf16.mxu1 %v1033_v40 }
 0x2eb   : > { %1082 = vmatpush1.bf16.msra.mxu0 %v1030_v60  ;;  %1155 = vmatpush1.bf16.msra.mxu1 %v1032_v61 }
 0x2ee   : > { %2761 = vmatmul.mubr.msk.bf16.vlgmr.msra.gmra.mrb[32].mxu0 %vm592_vm0, %v2920_v41  ;;  %2765 = vmatmul.mubr.msk.bf16.vlgmr.msra.gmra.mrb[32].mxu1 %vm592_vm0, %v2920_v41 }
 0x2ef   : > { %1117 = vmatprep.mubr.bf16.mxu0 %v3048_v1  ;;  %1190 = vmatprep.mubr.bf16.mxu1 %v3048_v1 }
 0x2f6   : > { %2762 = vmatmul.mubr.msk.bf16.gmra.mrb[36].mxu0 %vm592_vm0, %v2921_v62  ;;  %2766 = vmatmul.mubr.msk.bf16.gmra.mrb[36].mxu1 %vm592_vm0, %v2921_v62 }
 0x2f7   : > { %1127 = vmatprep.mubr.bf16.mxu0 %v3048_v1  ;;  %1200 = vmatprep.mubr.bf16.mxu1 %v3048_v1 }
 0x2fe   : > { %2763 = vmatmul.mubr.msk.bf16.gmra.mrb[40].mxu0 %vm592_vm0, %v2922_v37  ;;  %2767 = vmatmul.mubr.msk.bf16.gmra.mrb[40].mxu1 %vm592_vm0, %v2922_v37 }
 0x2ff   : > { %1137 = vmatprep.mubr.bf16.mxu0 %v3048_v1  ;;  %1210 = vmatprep.mubr.bf16.mxu1 %v3048_v1 }
 0x306   : > { %2764 = vmatmul.mubr.msk.bf16.gmra.mrb[44].mxu0 %vm592_vm0, %v2923_v50  ;;  %2768 = vmatmul.mubr.msk.bf16.gmra.mrb[44].mxu1 %vm592_vm0, %v2923_v50 }
 0x307   : > { %1342 = vmatprep.mubr.bf16.mxu0 %v3048_v1  ;;  %1415 = vmatprep.mubr.bf16.mxu1 %v3048_v1 }
 0x3c1   : > { %v1109_v58 = vpop.f32.mrb[32].mxu0  ;;  %v1182_v63 = vpop.f32.mrb[32].mxu1 }
 0x3c2   : > { %v1111_v0 = vpop.f32.mrb[33].mxu0  ;;  %v1184_v3 = vpop.f32.mrb[33].mxu1  ;;  %v1221_v22 = vmax.f32 %v1109_v58, 0.0  ;;  %v1223_v6 = vmax.f32 %v1182_v63, 0.0 }
 0x3c3   : > { %v1113_v4 = vpop.f32.mrb[34].mxu0  ;;  %v1186_v5 = vpop.f32.mrb[34].mxu1  ;;  %v1222_v10 = vmax.f32 %v1111_v0, 0.0  ;;  %v1224_v11 = vmax.f32 %v1184_v3, 0.0 }
 0x3c4   : > { %v1225_v7 = vmax.f32 %v1113_v4, 0.0  ;;  %v1227_v8 = vmax.f32 %v1186_v5, 0.0  ;;  %v1115_v9 = vpop.f32.mrb[35].mxu0  ;;  %v1188_v2 = vpop.f32.mrb[35].mxu1 }
 0x3c5   : > { %v1226_v25 = vmax.f32 %v1115_v9, 0.0  ;;  %v1228_v12 = vmax.f32 %v1188_v2, 0.0 }
 0x3c6   : > { %v1253_v13 = vpack.c.bf16 %v1225_v7, %v1221_v22  ;;  %v1255_v14 = vpack.c.bf16 %v1227_v8, %v1223_v6 }
 0x3c7   : > { %v1254_v15 = vpack.c.bf16 %v1226_v25, %v1222_v10  ;;  %v1256_v27 = vpack.c.bf16 %v1228_v12, %v1224_v11 }
 0x3c9   : > { %v1119_v28 = vpop.f32.mrb[36].mxu0  ;;  %v1192_v29 = vpop.f32.mrb[36].mxu1  ;;  %1310 = vmatprep.subr.bf16.mxu0 %v1254_v15  ;;  %1383 = vmatprep.subr.bf16.mxu1 %v1256_v27  ;;  %v2924_v27 = vld [vmem:[#allocation2 + $0x60] sm:$0xff]  }
 0x3ca   : > { %v1121_v30 = vpop.f32.mrb[37].mxu0  ;;  %v1194_v31 = vpop.f32.mrb[37].mxu1  ;;  %1311 = vmatpush1.bf16.msra.mxu0 %v1253_v13  ;;  %1384 = vmatpush1.bf16.msra.mxu1 %v1255_v14  ;;  %v1229_v18 = vmax.f32 %v1119_v28, 0.0  ;;  %v1231_v21 = vmax.f32 %v1192_v29, 0.0  ;;  %v2925_v28 = vld [vmem:[#allocation2 + $0x68] sm:$0xff]   ;;  %v2926_v29 = vld [vmem:[#allocation2 + $0x70] sm:$0xff]  }
 0x3cb   : > { %v1123_v16 = vpop.f32.mrb[38].mxu0  ;;  %v1196_v17 = vpop.f32.mrb[38].mxu1  ;;  %v1230_v44 = vmax.f32 %v1121_v30, 0.0  ;;  %v1232_v45 = vmax.f32 %v1194_v31, 0.0  ;;  %v2927_v30 = vld [vmem:[#allocation2 + $0x78] sm:$0xff]  }
 0x3cc   : > { %v1233_v32 = vmax.f32 %v1123_v16, 0.0  ;;  %v1235_v42 = vmax.f32 %v1196_v17, 0.0  ;;  %v1125_v43 = vpop.f32.mrb[39].mxu0  ;;  %v1198_v24 = vpop.f32.mrb[39].mxu1 }
 0x3cd   : > { %v1234_v46 = vmax.f32 %v1125_v43, 0.0  ;;  %v1236_v47 = vmax.f32 %v1198_v24, 0.0 }
 0x3ce   : > { %v1257_v48 = vpack.c.bf16 %v1233_v32, %v1229_v18  ;;  %v1259_v19 = vpack.c.bf16 %v1235_v42, %v1231_v21 }
 0x3cf   : > { %v1258_v49 = vpack.c.bf16 %v1234_v46, %v1230_v44  ;;  %v1260_v51 = vpack.c.bf16 %v1236_v47, %v1232_v45 }
 0x3d1   : > { %v1129_v52 = vpop.f32.mrb[40].mxu0  ;;  %v1202_v53 = vpop.f32.mrb[40].mxu1  ;;  %1312 = vmatprep.subr.bf16.mxu0 %v1258_v49  ;;  %1385 = vmatprep.subr.bf16.mxu1 %v1260_v51 }
 0x3d2   : > { %v1131_v54 = vpop.f32.mrb[41].mxu0  ;;  %v1204_v38 = vpop.f32.mrb[41].mxu1  ;;  %1313 = vmatpush1.bf16.msra.mxu0 %v1257_v48  ;;  %1386 = vmatpush1.bf16.msra.mxu1 %v1259_v19  ;;  %v1237_v56 = vmax.f32 %v1129_v52, 0.0  ;;  %v1239_v39 = vmax.f32 %v1202_v53, 0.0 }
 0x3d3   : > { %v1133_v55 = vpop.f32.mrb[42].mxu0  ;;  %v1206_v34 = vpop.f32.mrb[42].mxu1  ;;  %v1238_v59 = vmax.f32 %v1131_v54, 0.0  ;;  %v1240_v60 = vmax.f32 %v1204_v38, 0.0 }
 0x3d4   : > { %v1241_v57 = vmax.f32 %v1133_v55, 0.0  ;;  %v1243_v35 = vmax.f32 %v1206_v34, 0.0  ;;  %v1135_v33 = vpop.f32.mrb[43].mxu0  ;;  %v1208_v26 = vpop.f32.mrb[43].mxu1 }
 0x3d5   : > { %v1242_v61 = vmax.f32 %v1135_v33, 0.0  ;;  %v1244_v36 = vmax.f32 %v1208_v26, 0.0 }
 0x3d6   : > { %v1261_v40 = vpack.c.bf16 %v1241_v57, %v1237_v56  ;;  %v1263_v41 = vpack.c.bf16 %v1243_v35, %v1239_v39 }
 0x3d7   : > { %v1262_v62 = vpack.c.bf16 %v1242_v61, %v1238_v59  ;;  %v1264_v37 = vpack.c.bf16 %v1244_v36, %v1240_v60 }
 0x3d9   : > { %v1139_v50 = vpop.f32.mrb[44].mxu0  ;;  %v1212_v58 = vpop.f32.mrb[44].mxu1  ;;  %1314 = vmatprep.subr.bf16.mxu0 %v1262_v62  ;;  %1387 = vmatprep.subr.bf16.mxu1 %v1264_v37 }
 0x3da   : > { %v1141_v63 = vpop.f32.mrb[45].mxu0  ;;  %v1214_v0 = vpop.f32.mrb[45].mxu1  ;;  %1315 = vmatpush1.bf16.msra.mxu0 %v1261_v40  ;;  %1388 = vmatpush1.bf16.msra.mxu1 %v1263_v41  ;;  %v1245_v5 = vmax.f32 %v1139_v50, 0.0  ;;  %v1247_v22 = vmax.f32 %v1212_v58, 0.0 }
 0x3db   : > { %v1143_v3 = vpop.f32.mrb[46].mxu0  ;;  %v1216_v4 = vpop.f32.mrb[46].mxu1  ;;  %v1246_v2 = vmax.f32 %v1141_v63, 0.0  ;;  %v1248_v10 = vmax.f32 %v1214_v0, 0.0 }
 0x3dc   : > { %v1249_v6 = vmax.f32 %v1143_v3, 0.0  ;;  %v1251_v7 = vmax.f32 %v1216_v4, 0.0  ;;  %v1145_v8 = vpop.f32.mrb[47].mxu0  ;;  %v1218_v9 = vpop.f32.mrb[47].mxu1 }
 0x3dd   : > { %v1250_v11 = vmax.f32 %v1145_v8, 0.0  ;;  %v1252_v25 = vmax.f32 %v1218_v9, 0.0 }
 0x3de   : > { %v1265_v12 = vpack.c.bf16 %v1249_v6, %v1245_v5  ;;  %v1267_v13 = vpack.c.bf16 %v1251_v7, %v1247_v22 }
 0x3df   : > { %v1266_v14 = vpack.c.bf16 %v1250_v11, %v1246_v2  ;;  %v1268_v15 = vpack.c.bf16 %v1252_v25, %v1248_v10 }
 0x3e1   : > { %1316 = vmatprep.subr.bf16.mxu0 %v1266_v14  ;;  %1389 = vmatprep.subr.bf16.mxu1 %v1268_v15 }
 0x3e2   : > { %1317 = vmatpush1.bf16.msra.mxu0 %v1265_v12  ;;  %1390 = vmatpush1.bf16.msra.mxu1 %v1267_v13 }
 0x3e5   : > { %2773 = vmatmul.mubr.msk.bf16.vlgmr.msra.gmra.mrb[48].mxu0 %vm592_vm0, %v2924_v27  ;;  %2777 = vmatmul.mubr.msk.bf16.vlgmr.msra.gmra.mrb[48].mxu1 %vm592_vm0, %v2924_v27 }
 0x3e6   : > { %1352 = vmatprep.mubr.bf16.mxu0 %v3048_v1  ;;  %1425 = vmatprep.mubr.bf16.mxu1 %v3048_v1 }
 0x3ed   : > { %2774 = vmatmul.mubr.msk.bf16.gmra.mrb[52].mxu0 %vm592_vm0, %v2925_v28  ;;  %2778 = vmatmul.mubr.msk.bf16.gmra.mrb[52].mxu1 %vm592_vm0, %v2925_v28 }
 0x3ee   : > { %1362 = vmatprep.mubr.bf16.mxu0 %v3048_v1  ;;  %1435 = vmatprep.mubr.bf16.mxu1 %v3048_v1 }
 0x3f5   : > { %2775 = vmatmul.mubr.msk.bf16.gmra.mrb[56].mxu0 %vm592_vm0, %v2926_v29  ;;  %2779 = vmatmul.mubr.msk.bf16.gmra.mrb[56].mxu1 %vm592_vm0, %v2926_v29 }
 0x3f6   : > { %1372 = vmatprep.mubr.bf16.mxu0 %v3048_v1  ;;  %1445 = vmatprep.mubr.bf16.mxu1 %v3048_v1 }
 0x3fd   : > { %2776 = vmatmul.mubr.msk.bf16.gmra.mrb[60].mxu0 %vm592_vm0, %v2927_v30  ;;  %2780 = vmatmul.mubr.msk.bf16.gmra.mrb[60].mxu1 %vm592_vm0, %v2927_v30 }
 0x3fe   : > { %1577 = vmatprep.mubr.bf16.mxu0 %v3048_v1  ;;  %1650 = vmatprep.mubr.bf16.mxu1 %v3048_v1 }
 0x4b8   : > { %v1344_v31 = vpop.f32.mrb[48].mxu0  ;;  %v1417_v16 = vpop.f32.mrb[48].mxu1 }
 0x4b9   : > { %v1346_v17 = vpop.f32.mrb[49].mxu0  ;;  %v1419_v18 = vpop.f32.mrb[49].mxu1  ;;  %v1456_v42 = vmax.f32 %v1344_v31, 0.0  ;;  %v1458_v43 = vmax.f32 %v1417_v16, 0.0 }
 0x4ba   : > { %v1348_v21 = vpop.f32.mrb[50].mxu0  ;;  %v1421_v32 = vpop.f32.mrb[50].mxu1  ;;  %v1457_v47 = vmax.f32 %v1346_v17, 0.0  ;;  %v1459_v48 = vmax.f32 %v1419_v18, 0.0 }
 0x4bb   : > { %v1460_v24 = vmax.f32 %v1348_v21, 0.0  ;;  %v1462_v44 = vmax.f32 %v1421_v32, 0.0  ;;  %v1350_v45 = vpop.f32.mrb[51].mxu0  ;;  %v1423_v46 = vpop.f32.mrb[51].mxu1 }
 0x4bc   : > { %v1461_v19 = vmax.f32 %v1350_v45, 0.0  ;;  %v1463_v49 = vmax.f32 %v1423_v46, 0.0 }
 0x4bd   : > { %v1488_v51 = vpack.c.bf16 %v1460_v24, %v1456_v42  ;;  %v1490_v52 = vpack.c.bf16 %v1462_v44, %v1458_v43 }
 0x4be   : > { %v1489_v53 = vpack.c.bf16 %v1461_v19, %v1457_v47  ;;  %v1491_v54 = vpack.c.bf16 %v1463_v49, %v1459_v48 }
 0x4c0   : > { %v1354_v38 = vpop.f32.mrb[52].mxu0  ;;  %v1427_v55 = vpop.f32.mrb[52].mxu1  ;;  %1545 = vmatprep.subr.bf16.mxu0 %v1489_v53  ;;  %1618 = vmatprep.subr.bf16.mxu1 %v1491_v54  ;;  %v2928_v54 = vld [vmem:[#allocation2 + $0x80] sm:$0xff]  }
 0x4c1   : > { %v1356_v34 = vpop.f32.mrb[53].mxu0  ;;  %v1429_v56 = vpop.f32.mrb[53].mxu1  ;;  %1546 = vmatpush1.bf16.msra.mxu0 %v1488_v51  ;;  %1619 = vmatpush1.bf16.msra.mxu1 %v1490_v52  ;;  %v1464_v35 = vmax.f32 %v1354_v38, 0.0  ;;  %v1466_v33 = vmax.f32 %v1427_v55, 0.0  ;;  %v2929_v38 = vld [vmem:[#allocation2 + $0x88] sm:$0xff]   ;;  %v2930_v55 = vld [vmem:[#allocation2 + $0x90] sm:$0xff]  }
 0x4c2   : > { %v1358_v39 = vpop.f32.mrb[54].mxu0  ;;  %v1431_v57 = vpop.f32.mrb[54].mxu1  ;;  %v1465_v36 = vmax.f32 %v1356_v34, 0.0  ;;  %v1467_v40 = vmax.f32 %v1429_v56, 0.0  ;;  %v2931_v34 = vld [vmem:[#allocation2 + $0x98] sm:$0xff]  }
 0x4c3   : > { %v1468_v26 = vmax.f32 %v1358_v39, 0.0  ;;  %v1470_v59 = vmax.f32 %v1431_v57, 0.0  ;;  %v1360_v60 = vpop.f32.mrb[55].mxu0  ;;  %v1433_v61 = vpop.f32.mrb[55].mxu1 }
 0x4c4   : > { %v1469_v41 = vmax.f32 %v1360_v60, 0.0  ;;  %v1471_v62 = vmax.f32 %v1433_v61, 0.0 }
 0x4c5   : > { %v1492_v37 = vpack.c.bf16 %v1468_v26, %v1464_v35  ;;  %v1494_v50 = vpack.c.bf16 %v1470_v59, %v1466_v33 }
 0x4c6   : > { %v1493_v58 = vpack.c.bf16 %v1469_v41, %v1465_v36  ;;  %v1495_v63 = vpack.c.bf16 %v1471_v62, %v1467_v40 }
 0x4c8   : > { %v1364_v0 = vpop.f32.mrb[56].mxu0  ;;  %v1437_v3 = vpop.f32.mrb[56].mxu1  ;;  %1547 = vmatprep.subr.bf16.mxu0 %v1493_v58  ;;  %1620 = vmatprep.subr.bf16.mxu1 %v1495_v63 }
 0x4c9   : > { %v1366_v4 = vpop.f32.mrb[57].mxu0  ;;  %v1439_v5 = vpop.f32.mrb[57].mxu1  ;;  %1548 = vmatpush1.bf16.msra.mxu0 %v1492_v37  ;;  %1621 = vmatpush1.bf16.msra.mxu1 %v1494_v50  ;;  %v1472_v7 = vmax.f32 %v1364_v0, 0.0  ;;  %v1474_v8 = vmax.f32 %v1437_v3, 0.0 }
 0x4ca   : > { %v1368_v22 = vpop.f32.mrb[58].mxu0  ;;  %v1441_v6 = vpop.f32.mrb[58].mxu1  ;;  %v1473_v25 = vmax.f32 %v1366_v4, 0.0  ;;  %v1475_v12 = vmax.f32 %v1439_v5, 0.0 }
 0x4cb   : > { %v1476_v9 = vmax.f32 %v1368_v22, 0.0  ;;  %v1478_v2 = vmax.f32 %v1441_v6, 0.0  ;;  %v1370_v10 = vpop.f32.mrb[59].mxu0  ;;  %v1443_v11 = vpop.f32.mrb[59].mxu1 }
 0x4cc   : > { %v1477_v13 = vmax.f32 %v1370_v10, 0.0  ;;  %v1479_v14 = vmax.f32 %v1443_v11, 0.0 }
 0x4cd   : > { %v1496_v15 = vpack.c.bf16 %v1476_v9, %v1472_v7  ;;  %v1498_v27 = vpack.c.bf16 %v1478_v2, %v1474_v8 }
 0x4ce   : > { %v1497_v28 = vpack.c.bf16 %v1477_v13, %v1473_v25  ;;  %v1499_v29 = vpack.c.bf16 %v1479_v14, %v1475_v12 }
 0x4d0   : > { %v1374_v30 = vpop.f32.mrb[60].mxu0  ;;  %v1447_v31 = vpop.f32.mrb[60].mxu1  ;;  %1549 = vmatprep.subr.bf16.mxu0 %v1497_v28  ;;  %1622 = vmatprep.subr.bf16.mxu1 %v1499_v29 }
 0x4d1   : > { %v1376_v16 = vpop.f32.mrb[61].mxu0  ;;  %v1449_v17 = vpop.f32.mrb[61].mxu1  ;;  %1550 = vmatpush1.bf16.msra.mxu0 %v1496_v15  ;;  %1623 = vmatpush1.bf16.msra.mxu1 %v1498_v27  ;;  %v1480_v32 = vmax.f32 %v1374_v30, 0.0  ;;  %v1482_v42 = vmax.f32 %v1447_v31, 0.0 }
 0x4d2   : > { %v1378_v18 = vpop.f32.mrb[62].mxu0  ;;  %v1451_v21 = vpop.f32.mrb[62].mxu1  ;;  %v1481_v46 = vmax.f32 %v1376_v16, 0.0  ;;  %v1483_v47 = vmax.f32 %v1449_v17, 0.0 }
 0x4d3   : > { %v1484_v43 = vmax.f32 %v1378_v18, 0.0  ;;  %v1486_v24 = vmax.f32 %v1451_v21, 0.0  ;;  %v1380_v44 = vpop.f32.mrb[63].mxu0  ;;  %v1453_v45 = vpop.f32.mrb[63].mxu1 }
 0x4d4   : > { %v1485_v48 = vmax.f32 %v1380_v44, 0.0  ;;  %v1487_v19 = vmax.f32 %v1453_v45, 0.0 }
 0x4d5   : > { %v1500_v49 = vpack.c.bf16 %v1484_v43, %v1480_v32  ;;  %v1502_v51 = vpack.c.bf16 %v1486_v24, %v1482_v42 }
 0x4d6   : > { %v1501_v52 = vpack.c.bf16 %v1485_v48, %v1481_v46  ;;  %v1503_v53 = vpack.c.bf16 %v1487_v19, %v1483_v47 }
 0x4d8   : > { %1551 = vmatprep.subr.bf16.mxu0 %v1501_v52  ;;  %1624 = vmatprep.subr.bf16.mxu1 %v1503_v53 }
 0x4d9   : > { %1552 = vmatpush1.bf16.msra.mxu0 %v1500_v49  ;;  %1625 = vmatpush1.bf16.msra.mxu1 %v1502_v51 }
 0x4dc   : > { %2785 = vmatmul.mubr.msk.bf16.vlgmr.msra.gmra.mrb[64].mxu0 %vm592_vm0, %v2928_v54  ;;  %2789 = vmatmul.mubr.msk.bf16.vlgmr.msra.gmra.mrb[64].mxu1 %vm592_vm0, %v2928_v54 }
 0x4dd   : > { %1587 = vmatprep.mubr.bf16.mxu0 %v3048_v1  ;;  %1660 = vmatprep.mubr.bf16.mxu1 %v3048_v1 }
 0x4e4   : > { %2786 = vmatmul.mubr.msk.bf16.gmra.mrb[68].mxu0 %vm592_vm0, %v2929_v38  ;;  %2790 = vmatmul.mubr.msk.bf16.gmra.mrb[68].mxu1 %vm592_vm0, %v2929_v38 }
 0x4e5   : > { %1597 = vmatprep.mubr.bf16.mxu0 %v3048_v1  ;;  %1670 = vmatprep.mubr.bf16.mxu1 %v3048_v1 }
 0x4ec   : > { %2787 = vmatmul.mubr.msk.bf16.gmra.mrb[72].mxu0 %vm592_vm0, %v2930_v55  ;;  %2791 = vmatmul.mubr.msk.bf16.gmra.mrb[72].mxu1 %vm592_vm0, %v2930_v55 }
 0x4ed   : > { %1607 = vmatprep.mubr.bf16.mxu0 %v3048_v1  ;;  %1680 = vmatprep.mubr.bf16.mxu1 %v3048_v1 }
 0x4f4   : > { %2788 = vmatmul.mubr.msk.bf16.gmra.mrb[76].mxu0 %vm592_vm0, %v2931_v34  ;;  %2792 = vmatmul.mubr.msk.bf16.gmra.mrb[76].mxu1 %vm592_vm0, %v2931_v34 }
 0x4f5   : > { %1812 = vmatprep.mubr.bf16.mxu0 %v3048_v1  ;;  %1885 = vmatprep.mubr.bf16.mxu1 %v3048_v1 }
 0x5af   : > { %v1579_v56 = vpop.f32.mrb[64].mxu0  ;;  %v1652_v39 = vpop.f32.mrb[64].mxu1 }
 0x5b0   : > { %v1581_v57 = vpop.f32.mrb[65].mxu0  ;;  %v1654_v35 = vpop.f32.mrb[65].mxu1  ;;  %v1691_v59 = vmax.f32 %v1579_v56, 0.0  ;;  %v1693_v60 = vmax.f32 %v1652_v39, 0.0 }
 0x5b1   : > { %v1583_v33 = vpop.f32.mrb[66].mxu0  ;;  %v1656_v26 = vpop.f32.mrb[66].mxu1  ;;  %v1692_v62 = vmax.f32 %v1581_v57, 0.0  ;;  %v1694_v37 = vmax.f32 %v1654_v35, 0.0 }
 0x5b2   : > { %v1695_v61 = vmax.f32 %v1583_v33, 0.0  ;;  %v1697_v36 = vmax.f32 %v1656_v26, 0.0  ;;  %v1585_v40 = vpop.f32.mrb[67].mxu0  ;;  %v1658_v41 = vpop.f32.mrb[67].mxu1 }
 0x5b3   : > { %v1696_v50 = vmax.f32 %v1585_v40, 0.0  ;;  %v1698_v58 = vmax.f32 %v1658_v41, 0.0 }
 0x5b4   : > { %v1723_v63 = vpack.c.bf16 %v1695_v61, %v1691_v59  ;;  %v1725_v0 = vpack.c.bf16 %v1697_v36, %v1693_v60 }
 0x5b5   : > { %v1724_v3 = vpack.c.bf16 %v1696_v50, %v1692_v62  ;;  %v1726_v4 = vpack.c.bf16 %v1698_v58, %v1694_v37 }
 0x5b7   : > { %v1589_v5 = vpop.f32.mrb[68].mxu0  ;;  %v1662_v22 = vpop.f32.mrb[68].mxu1  ;;  %1780 = vmatprep.subr.bf16.mxu0 %v1724_v3  ;;  %1853 = vmatprep.subr.bf16.mxu1 %v1726_v4  ;;  %v2932_v4 = vld [vmem:[#allocation2 + $0xa0] sm:$0xff]  }
 0x5b8   : > { %v1591_v6 = vpop.f32.mrb[69].mxu0  ;;  %v1664_v7 = vpop.f32.mrb[69].mxu1  ;;  %1781 = vmatpush1.bf16.msra.mxu0 %v1723_v63  ;;  %1854 = vmatpush1.bf16.msra.mxu1 %v1725_v0  ;;  %v1699_v2 = vmax.f32 %v1589_v5, 0.0  ;;  %v1701_v10 = vmax.f32 %v1662_v22, 0.0  ;;  %v2933_v5 = vld [vmem:[#allocation2 + $0xa8] sm:$0xff]   ;;  %v2934_v22 = vld [vmem:[#allocation2 + $0xb0] sm:$0xff]  }
 0x5b9   : > { %v1593_v8 = vpop.f32.mrb[70].mxu0  ;;  %v1666_v9 = vpop.f32.mrb[70].mxu1  ;;  %v1700_v14 = vmax.f32 %v1591_v6, 0.0  ;;  %v1702_v15 = vmax.f32 %v1664_v7, 0.0  ;;  %v2935_v6 = vld [vmem:[#allocation2 + $0xb8] sm:$0xff]  }
 0x5ba   : > { %v1703_v11 = vmax.f32 %v1593_v8, 0.0  ;;  %v1705_v25 = vmax.f32 %v1666_v9, 0.0  ;;  %v1595_v12 = vpop.f32.mrb[71].mxu0  ;;  %v1668_v13 = vpop.f32.mrb[71].mxu1 }
 0x5bb   : > { %v1704_v27 = vmax.f32 %v1595_v12, 0.0  ;;  %v1706_v28 = vmax.f32 %v1668_v13, 0.0 }
 0x5bc   : > { %v1727_v29 = vpack.c.bf16 %v1703_v11, %v1699_v2  ;;  %v1729_v30 = vpack.c.bf16 %v1705_v25, %v1701_v10 }
 0x5bd   : > { %v1728_v31 = vpack.c.bf16 %v1704_v27, %v1700_v14  ;;  %v1730_v16 = vpack.c.bf16 %v1706_v28, %v1702_v15 }
 0x5bf   : > { %v1599_v17 = vpop.f32.mrb[72].mxu0  ;;  %v1672_v18 = vpop.f32.mrb[72].mxu1  ;;  %1782 = vmatprep.subr.bf16.mxu0 %v1728_v31  ;;  %1855 = vmatprep.subr.bf16.mxu1 %v1730_v16 }
 0x5c0   : > { %v1601_v21 = vpop.f32.mrb[73].mxu0  ;;  %v1674_v32 = vpop.f32.mrb[73].mxu1  ;;  %1783 = vmatpush1.bf16.msra.mxu0 %v1727_v29  ;;  %1856 = vmatpush1.bf16.msra.mxu1 %v1729_v30  ;;  %v1707_v24 = vmax.f32 %v1599_v17, 0.0  ;;  %v1709_v44 = vmax.f32 %v1672_v18, 0.0 }
 0x5c1   : > { %v1603_v42 = vpop.f32.mrb[74].mxu0  ;;  %v1676_v43 = vpop.f32.mrb[74].mxu1  ;;  %v1708_v19 = vmax.f32 %v1601_v21, 0.0  ;;  %v1710_v49 = vmax.f32 %v1674_v32, 0.0 }
 0x5c2   : > { %v1711_v45 = vmax.f32 %v1603_v42, 0.0  ;;  %v1713_v46 = vmax.f32 %v1676_v43, 0.0  ;;  %v1605_v47 = vpop.f32.mrb[75].mxu0  ;;  %v1678_v48 = vpop.f32.mrb[75].mxu1 }
 0x5c3   : > { %v1712_v51 = vmax.f32 %v1605_v47, 0.0  ;;  %v1714_v52 = vmax.f32 %v1678_v48, 0.0 }
 0x5c4   : > { %v1731_v53 = vpack.c.bf16 %v1711_v45, %v1707_v24  ;;  %v1733_v54 = vpack.c.bf16 %v1713_v46, %v1709_v44 }
 0x5c5   : > { %v1732_v38 = vpack.c.bf16 %v1712_v51, %v1708_v19  ;;  %v1734_v55 = vpack.c.bf16 %v1714_v52, %v1710_v49 }
 0x5c7   : > { %v1609_v34 = vpop.f32.mrb[76].mxu0  ;;  %v1682_v56 = vpop.f32.mrb[76].mxu1  ;;  %1784 = vmatprep.subr.bf16.mxu0 %v1732_v38  ;;  %1857 = vmatprep.subr.bf16.mxu1 %v1734_v55 }
 0x5c8   : > { %v1611_v39 = vpop.f32.mrb[77].mxu0  ;;  %v1684_v57 = vpop.f32.mrb[77].mxu1  ;;  %1785 = vmatpush1.bf16.msra.mxu0 %v1731_v53  ;;  %1858 = vmatpush1.bf16.msra.mxu1 %v1733_v54  ;;  %v1715_v26 = vmax.f32 %v1609_v34, 0.0  ;;  %v1717_v59 = vmax.f32 %v1682_v56, 0.0 }
 0x5c9   : > { %v1613_v35 = vpop.f32.mrb[78].mxu0  ;;  %v1686_v33 = vpop.f32.mrb[78].mxu1  ;;  %v1716_v41 = vmax.f32 %v1611_v39, 0.0  ;;  %v1718_v62 = vmax.f32 %v1684_v57, 0.0 }
 0x5ca   : > { %v1719_v60 = vmax.f32 %v1613_v35, 0.0  ;;  %v1721_v61 = vmax.f32 %v1686_v33, 0.0  ;;  %v1615_v36 = vpop.f32.mrb[79].mxu0  ;;  %v1688_v40 = vpop.f32.mrb[79].mxu1 }
 0x5cb   : > { %v1720_v37 = vmax.f32 %v1615_v36, 0.0  ;;  %v1722_v50 = vmax.f32 %v1688_v40, 0.0 }
 0x5cc   : > { %v1735_v58 = vpack.c.bf16 %v1719_v60, %v1715_v26  ;;  %v1737_v63 = vpack.c.bf16 %v1721_v61, %v1717_v59 }
 0x5cd   : > { %v1736_v0 = vpack.c.bf16 %v1720_v37, %v1716_v41  ;;  %v1738_v3 = vpack.c.bf16 %v1722_v50, %v1718_v62 }
 0x5cf   : > { %1786 = vmatprep.subr.bf16.mxu0 %v1736_v0  ;;  %1859 = vmatprep.subr.bf16.mxu1 %v1738_v3 }
 0x5d0   : > { %1787 = vmatpush1.bf16.msra.mxu0 %v1735_v58  ;;  %1860 = vmatpush1.bf16.msra.mxu1 %v1737_v63 }
 0x5d3   : > { %2797 = vmatmul.mubr.msk.bf16.vlgmr.msra.gmra.mrb[80].mxu0 %vm592_vm0, %v2932_v4  ;;  %2801 = vmatmul.mubr.msk.bf16.vlgmr.msra.gmra.mrb[80].mxu1 %vm592_vm0, %v2932_v4 }
 0x5d4   : > { %1822 = vmatprep.mubr.bf16.mxu0 %v3048_v1  ;;  %1895 = vmatprep.mubr.bf16.mxu1 %v3048_v1 }
 0x5db   : > { %2798 = vmatmul.mubr.msk.bf16.gmra.mrb[84].mxu0 %vm592_vm0, %v2933_v5  ;;  %2802 = vmatmul.mubr.msk.bf16.gmra.mrb[84].mxu1 %vm592_vm0, %v2933_v5 }
 0x5dc   : > { %1832 = vmatprep.mubr.bf16.mxu0 %v3048_v1  ;;  %1905 = vmatprep.mubr.bf16.mxu1 %v3048_v1 }
 0x5e3   : > { %2799 = vmatmul.mubr.msk.bf16.gmra.mrb[88].mxu0 %vm592_vm0, %v2934_v22  ;;  %2803 = vmatmul.mubr.msk.bf16.gmra.mrb[88].mxu1 %vm592_vm0, %v2934_v22 }
 0x5e4   : > { %1842 = vmatprep.mubr.bf16.mxu0 %v3048_v1  ;;  %1915 = vmatprep.mubr.bf16.mxu1 %v3048_v1 }
 0x5eb   : > { %2800 = vmatmul.mubr.msk.bf16.gmra.mrb[92].mxu0 %vm592_vm0, %v2935_v6  ;;  %2804 = vmatmul.mubr.msk.bf16.gmra.mrb[92].mxu1 %vm592_vm0, %v2935_v6 }
 0x5ec   : > { %2047 = vmatprep.mubr.bf16.mxu0 %v3048_v1  ;;  %2120 = vmatprep.mubr.bf16.mxu1 %v3048_v1 }
 0x6a6   : > { %v1814_v7 = vpop.f32.mrb[80].mxu0  ;;  %v1887_v8 = vpop.f32.mrb[80].mxu1 }
 0x6a7   : > { %v1816_v9 = vpop.f32.mrb[81].mxu0  ;;  %v1889_v2 = vpop.f32.mrb[81].mxu1  ;;  %v1926_v25 = vmax.f32 %v1814_v7, 0.0  ;;  %v1928_v12 = vmax.f32 %v1887_v8, 0.0 }
 0x6a8   : > { %v1818_v10 = vpop.f32.mrb[82].mxu0  ;;  %v1891_v11 = vpop.f32.mrb[82].mxu1  ;;  %v1927_v28 = vmax.f32 %v1816_v9, 0.0  ;;  %v1929_v29 = vmax.f32 %v1889_v2, 0.0 }
 0x6a9   : > { %v1930_v13 = vmax.f32 %v1818_v10, 0.0  ;;  %v1932_v14 = vmax.f32 %v1891_v11, 0.0  ;;  %v1820_v15 = vpop.f32.mrb[83].mxu0  ;;  %v1893_v27 = vpop.f32.mrb[83].mxu1 }
 0x6aa   : > { %v1931_v30 = vmax.f32 %v1820_v15, 0.0  ;;  %v1933_v31 = vmax.f32 %v1893_v27, 0.0 }
 0x6ab   : > { %v1958_v16 = vpack.c.bf16 %v1930_v13, %v1926_v25  ;;  %v1960_v17 = vpack.c.bf16 %v1932_v14, %v1928_v12 }
 0x6ac   : > { %v1959_v18 = vpack.c.bf16 %v1931_v30, %v1927_v28  ;;  %v1961_v21 = vpack.c.bf16 %v1933_v31, %v1929_v29 }
 0x6ae   : > { %v1824_v32 = vpop.f32.mrb[84].mxu0  ;;  %v1897_v42 = vpop.f32.mrb[84].mxu1  ;;  %2015 = vmatprep.subr.bf16.mxu0 %v1959_v18  ;;  %2088 = vmatprep.subr.bf16.mxu1 %v1961_v21  ;;  %v2936_v21 = vld [vmem:[#allocation2 + $0xc0] sm:$0xff]  }
 0x6af   : > { %v1826_v43 = vpop.f32.mrb[85].mxu0  ;;  %v1899_v24 = vpop.f32.mrb[85].mxu1  ;;  %2016 = vmatpush1.bf16.msra.mxu0 %v1958_v16  ;;  %2089 = vmatpush1.bf16.msra.mxu1 %v1960_v17  ;;  %v1934_v46 = vmax.f32 %v1824_v32, 0.0  ;;  %v1936_v47 = vmax.f32 %v1897_v42, 0.0  ;;  %v2937_v32 = vld [vmem:[#allocation2 + $0xc8] sm:$0xff]   ;;  %v2938_v42 = vld [vmem:[#allocation2 + $0xd0] sm:$0xff]  }
 0x6b0   : > { %v1828_v44 = vpop.f32.mrb[86].mxu0  ;;  %v1901_v45 = vpop.f32.mrb[86].mxu1  ;;  %v1935_v52 = vmax.f32 %v1826_v43, 0.0  ;;  %v1937_v53 = vmax.f32 %v1899_v24, 0.0  ;;  %v2939_v43 = vld [vmem:[#allocation2 + $0xd8] sm:$0xff]  }
 0x6b1   : > { %v1938_v48 = vmax.f32 %v1828_v44, 0.0  ;;  %v1940_v19 = vmax.f32 %v1901_v45, 0.0  ;;  %v1830_v49 = vpop.f32.mrb[87].mxu0  ;;  %v1903_v51 = vpop.f32.mrb[87].mxu1 }
 0x6b2   : > { %v1939_v54 = vmax.f32 %v1830_v49, 0.0  ;;  %v1941_v38 = vmax.f32 %v1903_v51, 0.0 }
 0x6b3   : > { %v1962_v55 = vpack.c.bf16 %v1938_v48, %v1934_v46  ;;  %v1964_v34 = vpack.c.bf16 %v1940_v19, %v1936_v47 }
 0x6b4   : > { %v1963_v56 = vpack.c.bf16 %v1939_v54, %v1935_v52  ;;  %v1965_v39 = vpack.c.bf16 %v1941_v38, %v1937_v53 }
 0x6b6   : > { %v1834_v57 = vpop.f32.mrb[88].mxu0  ;;  %v1907_v35 = vpop.f32.mrb[88].mxu1  ;;  %2017 = vmatprep.subr.bf16.mxu0 %v1963_v56  ;;  %2090 = vmatprep.subr.bf16.mxu1 %v1965_v39 }
 0x6b7   : > { %v1836_v33 = vpop.f32.mrb[89].mxu0  ;;  %v1909_v26 = vpop.f32.mrb[89].mxu1  ;;  %2018 = vmatpush1.bf16.msra.mxu0 %v1962_v55  ;;  %2091 = vmatpush1.bf16.msra.mxu1 %v1964_v34  ;;  %v1942_v61 = vmax.f32 %v1834_v57, 0.0  ;;  %v1944_v36 = vmax.f32 %v1907_v35, 0.0 }
 0x6b8   : > { %v1838_v59 = vpop.f32.mrb[90].mxu0  ;;  %v1911_v60 = vpop.f32.mrb[90].mxu1  ;;  %v1943_v50 = vmax.f32 %v1836_v33, 0.0  ;;  %v1945_v58 = vmax.f32 %v1909_v26, 0.0 }
 0x6b9   : > { %v1946_v40 = vmax.f32 %v1838_v59, 0.0  ;;  %v1948_v41 = vmax.f32 %v1911_v60, 0.0  ;;  %v1840_v62 = vpop.f32.mrb[91].mxu0  ;;  %v1913_v37 = vpop.f32.mrb[91].mxu1 }
 0x6ba   : > { %v1947_v63 = vmax.f32 %v1840_v62, 0.0  ;;  %v1949_v0 = vmax.f32 %v1913_v37, 0.0 }
 0x6bb   : > { %v1966_v3 = vpack.c.bf16 %v1946_v40, %v1942_v61  ;;  %v1968_v4 = vpack.c.bf16 %v1948_v41, %v1944_v36 }
 0x6bc   : > { %v1967_v5 = vpack.c.bf16 %v1947_v63, %v1943_v50  ;;  %v1969_v22 = vpack.c.bf16 %v1949_v0, %v1945_v58 }
 0x6be   : > { %v1844_v6 = vpop.f32.mrb[92].mxu0  ;;  %v1917_v7 = vpop.f32.mrb[92].mxu1  ;;  %2019 = vmatprep.subr.bf16.mxu0 %v1967_v5  ;;  %2092 = vmatprep.subr.bf16.mxu1 %v1969_v22 }
 0x6bf   : > { %v1846_v8 = vpop.f32.mrb[93].mxu0  ;;  %v1919_v9 = vpop.f32.mrb[93].mxu1  ;;  %2020 = vmatpush1.bf16.msra.mxu0 %v1966_v3  ;;  %2093 = vmatpush1.bf16.msra.mxu1 %v1968_v4  ;;  %v1950_v11 = vmax.f32 %v1844_v6, 0.0  ;;  %v1952_v25 = vmax.f32 %v1917_v7, 0.0 }
 0x6c0   : > { %v1848_v2 = vpop.f32.mrb[94].mxu0  ;;  %v1921_v10 = vpop.f32.mrb[94].mxu1  ;;  %v1951_v27 = vmax.f32 %v1846_v8, 0.0  ;;  %v1953_v28 = vmax.f32 %v1919_v9, 0.0 }
 0x6c1   : > { %v1954_v12 = vmax.f32 %v1848_v2, 0.0  ;;  %v1956_v13 = vmax.f32 %v1921_v10, 0.0  ;;  %v1850_v14 = vpop.f32.mrb[95].mxu0  ;;  %v1923_v15 = vpop.f32.mrb[95].mxu1 }
 0x6c2   : > { %v1955_v29 = vmax.f32 %v1850_v14, 0.0  ;;  %v1957_v30 = vmax.f32 %v1923_v15, 0.0 }
 0x6c3   : > { %v1970_v31 = vpack.c.bf16 %v1954_v12, %v1950_v11  ;;  %v1972_v16 = vpack.c.bf16 %v1956_v13, %v1952_v25 }
 0x6c4   : > { %v1971_v17 = vpack.c.bf16 %v1955_v29, %v1951_v27  ;;  %v1973_v18 = vpack.c.bf16 %v1957_v30, %v1953_v28 }
 0x6c6   : > { %2021 = vmatprep.subr.bf16.mxu0 %v1971_v17  ;;  %2094 = vmatprep.subr.bf16.mxu1 %v1973_v18 }
 0x6c7   : > { %2022 = vmatpush1.bf16.msra.mxu0 %v1970_v31  ;;  %2095 = vmatpush1.bf16.msra.mxu1 %v1972_v16 }
 0x6ca   : > { %2809 = vmatmul.mubr.msk.bf16.vlgmr.msra.gmra.mrb[96].mxu0 %vm592_vm0, %v2936_v21  ;;  %2813 = vmatmul.mubr.msk.bf16.vlgmr.msra.gmra.mrb[96].mxu1 %vm592_vm0, %v2936_v21 }
 0x6cb   : > { %2057 = vmatprep.mubr.bf16.mxu0 %v3048_v1  ;;  %2130 = vmatprep.mubr.bf16.mxu1 %v3048_v1 }
 0x6d2   : > { %2810 = vmatmul.mubr.msk.bf16.gmra.mrb[100].mxu0 %vm592_vm0, %v2937_v32  ;;  %2814 = vmatmul.mubr.msk.bf16.gmra.mrb[100].mxu1 %vm592_vm0, %v2937_v32 }
 0x6d3   : > { %2067 = vmatprep.mubr.bf16.mxu0 %v3048_v1  ;;  %2140 = vmatprep.mubr.bf16.mxu1 %v3048_v1 }
 0x6da   : > { %2811 = vmatmul.mubr.msk.bf16.gmra.mrb[104].mxu0 %vm592_vm0, %v2938_v42  ;;  %2815 = vmatmul.mubr.msk.bf16.gmra.mrb[104].mxu1 %vm592_vm0, %v2938_v42 }
 0x6db   : > { %2077 = vmatprep.mubr.bf16.mxu0 %v3048_v1  ;;  %2150 = vmatprep.mubr.bf16.mxu1 %v3048_v1 }
 0x6e2   : > { %2812 = vmatmul.mubr.msk.bf16.gmra.mrb[108].mxu0 %vm592_vm0, %v2939_v43  ;;  %2816 = vmatmul.mubr.msk.bf16.gmra.mrb[108].mxu1 %vm592_vm0, %v2939_v43 }
 0x6e3   : > { %2282 = vmatprep.mubr.bf16.mxu0 %v3048_v1  ;;  %2355 = vmatprep.mubr.bf16.mxu1 %v3048_v1 }
 0x79d   : > { %v2049_v24 = vpop.f32.mrb[96].mxu0  ;;  %v2122_v44 = vpop.f32.mrb[96].mxu1 }
 0x79e   : > { %v2051_v45 = vpop.f32.mrb[97].mxu0  ;;  %v2124_v46 = vpop.f32.mrb[97].mxu1  ;;  %v2161_v19 = vmax.f32 %v2049_v24, 0.0  ;;  %v2163_v49 = vmax.f32 %v2122_v44, 0.0 }
 0x79f   : > { %v2053_v47 = vpop.f32.mrb[98].mxu0  ;;  %v2126_v48 = vpop.f32.mrb[98].mxu1  ;;  %v2162_v38 = vmax.f32 %v2051_v45, 0.0  ;;  %v2164_v55 = vmax.f32 %v2124_v46, 0.0 }
 0x7a0   : > { %v2165_v51 = vmax.f32 %v2053_v47, 0.0  ;;  %v2167_v52 = vmax.f32 %v2126_v48, 0.0  ;;  %v2055_v53 = vpop.f32.mrb[99].mxu0  ;;  %v2128_v54 = vpop.f32.mrb[99].mxu1 }
 0x7a1   : > { %v2166_v34 = vmax.f32 %v2055_v53, 0.0  ;;  %v2168_v56 = vmax.f32 %v2128_v54, 0.0 }
 0x7a2   : > { %v2193_v39 = vpack.c.bf16 %v2165_v51, %v2161_v19  ;;  %v2195_v57 = vpack.c.bf16 %v2167_v52, %v2163_v49 }
 0x7a3   : > { %v2194_v35 = vpack.c.bf16 %v2166_v34, %v2162_v38  ;;  %v2196_v33 = vpack.c.bf16 %v2168_v56, %v2164_v55 }
 0x7a5   : > { %v2059_v26 = vpop.f32.mrb[100].mxu0  ;;  %v2132_v59 = vpop.f32.mrb[100].mxu1  ;;  %2250 = vmatprep.subr.bf16.mxu0 %v2194_v35  ;;  %2323 = vmatprep.subr.bf16.mxu1 %v2196_v33  ;;  %v2940_v33 = vld [vmem:[#allocation2 + $0xe0] sm:$0xff]  }
 0x7a6   : > { %v2061_v60 = vpop.f32.mrb[101].mxu0  ;;  %v2134_v61 = vpop.f32.mrb[101].mxu1  ;;  %2251 = vmatpush1.bf16.msra.mxu0 %v2193_v39  ;;  %2324 = vmatpush1.bf16.msra.mxu1 %v2195_v57  ;;  %v2169_v41 = vmax.f32 %v2059_v26, 0.0  ;;  %v2171_v62 = vmax.f32 %v2132_v59, 0.0  ;;  %v2941_v26 = vld [vmem:[#allocation2 + $0xe8] sm:$0xff]   ;;  %v2942_v59 = vld [vmem:[#allocation2 + $0xf0] sm:$0xff]  }
 0x7a7   : > { %v2063_v36 = vpop.f32.mrb[102].mxu0  ;;  %v2136_v40 = vpop.f32.mrb[102].mxu1  ;;  %v2170_v0 = vmax.f32 %v2061_v60, 0.0  ;;  %v2172_v3 = vmax.f32 %v2134_v61, 0.0  ;;  %v2943_v60 = vld [vmem:[#allocation2 + $0xf8] sm:$0xff]  }
 0x7a8   : > { %v2173_v37 = vmax.f32 %v2063_v36, 0.0  ;;  %v2175_v50 = vmax.f32 %v2136_v40, 0.0  ;;  %v2065_v58 = vpop.f32.mrb[103].mxu0  ;;  %v2138_v63 = vpop.f32.mrb[103].mxu1 }
 0x7a9   : > { %v2174_v4 = vmax.f32 %v2065_v58, 0.0  ;;  %v2176_v5 = vmax.f32 %v2138_v63, 0.0 }
 0x7aa   : > { %v2197_v22 = vpack.c.bf16 %v2173_v37, %v2169_v41  ;;  %v2199_v6 = vpack.c.bf16 %v2175_v50, %v2171_v62 }
 0x7ab   : > { %v2198_v7 = vpack.c.bf16 %v2174_v4, %v2170_v0  ;;  %v2200_v8 = vpack.c.bf16 %v2176_v5, %v2172_v3 }
 0x7ad   : > { %v2069_v9 = vpop.f32.mrb[104].mxu0  ;;  %v2142_v2 = vpop.f32.mrb[104].mxu1  ;;  %2252 = vmatprep.subr.bf16.mxu0 %v2198_v7  ;;  %2325 = vmatprep.subr.bf16.mxu1 %v2200_v8 }
 0x7ae   : > { %v2071_v10 = vpop.f32.mrb[105].mxu0  ;;  %v2144_v11 = vpop.f32.mrb[105].mxu1  ;;  %2253 = vmatpush1.bf16.msra.mxu0 %v2197_v22  ;;  %2326 = vmatpush1.bf16.msra.mxu1 %v2199_v6  ;;  %v2177_v13 = vmax.f32 %v2069_v9, 0.0  ;;  %v2179_v14 = vmax.f32 %v2142_v2, 0.0 }
 0x7af   : > { %v2073_v25 = vpop.f32.mrb[106].mxu0  ;;  %v2146_v12 = vpop.f32.mrb[106].mxu1  ;;  %v2178_v30 = vmax.f32 %v2071_v10, 0.0  ;;  %v2180_v31 = vmax.f32 %v2144_v11, 0.0 }
 0x7b0   : > { %v2181_v15 = vmax.f32 %v2073_v25, 0.0  ;;  %v2183_v27 = vmax.f32 %v2146_v12, 0.0  ;;  %v2075_v28 = vpop.f32.mrb[107].mxu0  ;;  %v2148_v29 = vpop.f32.mrb[107].mxu1 }
 0x7b1   : > { %v2182_v16 = vmax.f32 %v2075_v28, 0.0  ;;  %v2184_v17 = vmax.f32 %v2148_v29, 0.0 }
 0x7b2   : > { %v2201_v18 = vpack.c.bf16 %v2181_v15, %v2177_v13  ;;  %v2203_v21 = vpack.c.bf16 %v2183_v27, %v2179_v14 }
 0x7b3   : > { %v2202_v32 = vpack.c.bf16 %v2182_v16, %v2178_v30  ;;  %v2204_v42 = vpack.c.bf16 %v2184_v17, %v2180_v31 }
 0x7b5   : > { %v2079_v43 = vpop.f32.mrb[108].mxu0  ;;  %v2152_v24 = vpop.f32.mrb[108].mxu1  ;;  %2254 = vmatprep.subr.bf16.mxu0 %v2202_v32  ;;  %2327 = vmatprep.subr.bf16.mxu1 %v2204_v42 }
 0x7b6   : > { %v2081_v44 = vpop.f32.mrb[109].mxu0  ;;  %v2154_v45 = vpop.f32.mrb[109].mxu1  ;;  %2255 = vmatpush1.bf16.msra.mxu0 %v2201_v18  ;;  %2328 = vmatpush1.bf16.msra.mxu1 %v2203_v21  ;;  %v2185_v48 = vmax.f32 %v2079_v43, 0.0  ;;  %v2187_v19 = vmax.f32 %v2152_v24, 0.0 }
 0x7b7   : > { %v2083_v46 = vpop.f32.mrb[110].mxu0  ;;  %v2156_v47 = vpop.f32.mrb[110].mxu1  ;;  %v2186_v54 = vmax.f32 %v2081_v44, 0.0  ;;  %v2188_v38 = vmax.f32 %v2154_v45, 0.0 }
 0x7b8   : > { %v2189_v49 = vmax.f32 %v2083_v46, 0.0  ;;  %v2191_v51 = vmax.f32 %v2156_v47, 0.0  ;;  %v2085_v52 = vpop.f32.mrb[111].mxu0  ;;  %v2158_v53 = vpop.f32.mrb[111].mxu1 }
 0x7b9   : > { %v2190_v55 = vmax.f32 %v2085_v52, 0.0  ;;  %v2192_v34 = vmax.f32 %v2158_v53, 0.0 }
 0x7ba   : > { %v2205_v56 = vpack.c.bf16 %v2189_v49, %v2185_v48  ;;  %v2207_v39 = vpack.c.bf16 %v2191_v51, %v2187_v19 }
 0x7bb   : > { %v2206_v57 = vpack.c.bf16 %v2190_v55, %v2186_v54  ;;  %v2208_v35 = vpack.c.bf16 %v2192_v34, %v2188_v38 }
 0x7bd   : > { %2256 = vmatprep.subr.bf16.mxu0 %v2206_v57  ;;  %2329 = vmatprep.subr.bf16.mxu1 %v2208_v35 }
 0x7be   : > { %2257 = vmatpush1.bf16.msra.mxu0 %v2205_v56  ;;  %2330 = vmatpush1.bf16.msra.mxu1 %v2207_v39 }
 0x7c1   : > { %2821 = vmatmul.mubr.msk.bf16.vlgmr.msra.gmra.mrb[112].mxu0 %vm592_vm0, %v2940_v33  ;;  %2825 = vmatmul.mubr.msk.bf16.vlgmr.msra.gmra.mrb[112].mxu1 %vm592_vm0, %v2940_v33 }
 0x7c2   : > { %2292 = vmatprep.mubr.bf16.mxu0 %v3048_v1  ;;  %2365 = vmatprep.mubr.bf16.mxu1 %v3048_v1 }
 0x7c9   : > { %2822 = vmatmul.mubr.msk.bf16.gmra.mrb[116].mxu0 %vm592_vm0, %v2941_v26  ;;  %2826 = vmatmul.mubr.msk.bf16.gmra.mrb[116].mxu1 %vm592_vm0, %v2941_v26 }
 0x7ca   : > { %2302 = vmatprep.mubr.bf16.mxu0 %v3048_v1  ;;  %2375 = vmatprep.mubr.bf16.mxu1 %v3048_v1 }
 0x7d1   : > { %2823 = vmatmul.mubr.msk.bf16.gmra.mrb[120].mxu0 %vm592_vm0, %v2942_v59  ;;  %2827 = vmatmul.mubr.msk.bf16.gmra.mrb[120].mxu1 %vm592_vm0, %v2942_v59 }
 0x7d2   : > { %2312 = vmatprep.mubr.bf16.mxu0 %v3048_v1  ;;  %2385 = vmatprep.mubr.bf16.mxu1 %v3048_v1 }
 0x7d9   : > { %2824 = vmatmul.mubr.msk.bf16.gmra.mrb[124].mxu0 %vm592_vm0, %v2943_v60  ;;  %2828 = vmatmul.mubr.msk.bf16.gmra.mrb[124].mxu1 %vm592_vm0, %v2943_v60 }
 0x7da   : > { %2517 = vmatprep.mubr.bf16.mxu0 %v3048_v1  ;;  %2576 = vmatprep.mubr.bf16.mxu1 %v3048_v1 }
 0x894   : > { %v2284_v61 = vpop.f32.mrb[112].mxu0  ;;  %v2357_v36 = vpop.f32.mrb[112].mxu1 }
 0x895   : > { %v2286_v40 = vpop.f32.mrb[113].mxu0  ;;  %v2359_v41 = vpop.f32.mrb[113].mxu1  ;;  %v2396_v50 = vmax.f32 %v2284_v61, 0.0  ;;  %v2398_v58 = vmax.f32 %v2357_v36, 0.0 }
 0x896   : > { %v2288_v62 = vpop.f32.mrb[114].mxu0  ;;  %v2361_v37 = vpop.f32.mrb[114].mxu1  ;;  %v2397_v5 = vmax.f32 %v2286_v40, 0.0  ;;  %v2399_v22 = vmax.f32 %v2359_v41, 0.0 }
 0x897   : > { %v2400_v63 = vmax.f32 %v2288_v62, 0.0  ;;  %v2402_v0 = vmax.f32 %v2361_v37, 0.0  ;;  %v2290_v3 = vpop.f32.mrb[115].mxu0  ;;  %v2363_v4 = vpop.f32.mrb[115].mxu1 }
 0x898   : > { %v2401_v6 = vmax.f32 %v2290_v3, 0.0  ;;  %v2403_v7 = vmax.f32 %v2363_v4, 0.0 }
 0x899   : > { %v2428_v8 = vpack.c.bf16 %v2400_v63, %v2396_v50  ;;  %v2430_v9 = vpack.c.bf16 %v2402_v0, %v2398_v58 }
 0x89a   : > { %v2429_v2 = vpack.c.bf16 %v2401_v6, %v2397_v5  ;;  %v2431_v10 = vpack.c.bf16 %v2403_v7, %v2399_v22 }
 0x89c   : > { %v2294_v11 = vpop.f32.mrb[116].mxu0  ;;  %v2367_v25 = vpop.f32.mrb[116].mxu1  ;;  %2485 = vmatprep.subr.bf16.mxu0 %v2429_v2  ;;  %2544 = vmatprep.subr.bf16.mxu1 %v2431_v10  ;;  %v2944_v10 = vld [vmem:[#allocation2 + $0x100] sm:$0xff]  }
 0x89d   : > { %v2296_v12 = vpop.f32.mrb[117].mxu0  ;;  %v2369_v13 = vpop.f32.mrb[117].mxu1  ;;  %2486 = vmatpush1.bf16.msra.mxu0 %v2428_v8  ;;  %2545 = vmatpush1.bf16.msra.mxu1 %v2430_v9  ;;  %v2404_v27 = vmax.f32 %v2294_v11, 0.0  ;;  %v2406_v28 = vmax.f32 %v2367_v25, 0.0  ;;  %v2945_v11 = vld [vmem:[#allocation2 + $0x108] sm:$0xff]   ;;  %v2946_v25 = vld [vmem:[#allocation2 + $0x110] sm:$0xff]  }
 0x89e   : > { %v2298_v14 = vpop.f32.mrb[118].mxu0  ;;  %v2371_v15 = vpop.f32.mrb[118].mxu1  ;;  %v2405_v17 = vmax.f32 %v2296_v12, 0.0  ;;  %v2407_v18 = vmax.f32 %v2369_v13, 0.0  ;;  %v2947_v12 = vld [vmem:[#allocation2 + $0x118] sm:$0xff]  }
 0x89f   : > { %v2408_v29 = vmax.f32 %v2298_v14, 0.0  ;;  %v2410_v30 = vmax.f32 %v2371_v15, 0.0  ;;  %v2300_v31 = vpop.f32.mrb[119].mxu0  ;;  %v2373_v16 = vpop.f32.mrb[119].mxu1  ;;  %v3049_v13 = vmov 1966171168  }
 0x8a0   : > { %v2409_v21 = vmax.f32 %v2300_v31, 0.0  ;;  %v2411_v32 = vmax.f32 %v2373_v16, 0.0  ;;  %v2610_v14 = vunpack.c.l.s4 %v3049_v13 }
 0x8a1   : > { %v2432_v42 = vpack.c.bf16 %v2408_v29, %v2404_v27  ;;  %v2434_v43 = vpack.c.bf16 %v2410_v30, %v2406_v28 }
 0x8a2   : > { %v2433_v24 = vpack.c.bf16 %v2409_v21, %v2405_v17  ;;  %v2435_v44 = vpack.c.bf16 %v2411_v32, %v2407_v18  ;;  %v2611_v15 = vunpack.c.0.s8 %v2610_v14 }
 0x8a4   : > { %v2304_v45 = vpop.f32.mrb[120].mxu0  ;;  %v2377_v46 = vpop.f32.mrb[120].mxu1  ;;  %2487 = vmatprep.subr.bf16.mxu0 %v2433_v24  ;;  %2546 = vmatprep.subr.bf16.mxu1 %v2435_v44  ;;  %v2614_v29 = vsub.s32 %v2611_v15, %v3220_v23 }
 0x8a5   : > { %v2306_v47 = vpop.f32.mrb[121].mxu0  ;;  %v2379_v48 = vpop.f32.mrb[121].mxu1  ;;  %2488 = vmatpush1.bf16.msra.mxu0 %v2432_v42  ;;  %2547 = vmatpush1.bf16.msra.mxu1 %v2434_v43  ;;  %v2412_v51 = vmax.f32 %v2304_v45, 0.0  ;;  %v2414_v52 = vmax.f32 %v2377_v46, 0.0 }
 0x8a6   : > { %v2308_v19 = vpop.f32.mrb[122].mxu0  ;;  %v2381_v49 = vpop.f32.mrb[122].mxu1  ;;  %v2413_v34 = vmax.f32 %v2306_v47, 0.0  ;;  %v2415_v56 = vmax.f32 %v2379_v48, 0.0 }
 0x8a7   : > { %v2416_v53 = vmax.f32 %v2308_v19, 0.0  ;;  %v2418_v54 = vmax.f32 %v2381_v49, 0.0  ;;  %v2310_v38 = vpop.f32.mrb[123].mxu0  ;;  %v2383_v55 = vpop.f32.mrb[123].mxu1 }
 0x8a8   : > { %v2417_v39 = vmax.f32 %v2310_v38, 0.0  ;;  %v2419_v57 = vmax.f32 %v2383_v55, 0.0 }
 0x8a9   : > { %v2436_v35 = vpack.c.bf16 %v2416_v53, %v2412_v51  ;;  %v2438_v33 = vpack.c.bf16 %v2418_v54, %v2414_v52 }
 0x8aa   : > { %v2437_v26 = vpack.c.bf16 %v2417_v39, %v2413_v34  ;;  %v2439_v59 = vpack.c.bf16 %v2419_v57, %v2415_v56 }
 0x8ac   : > { %v2314_v60 = vpop.f32.mrb[124].mxu0  ;;  %v2387_v61 = vpop.f32.mrb[124].mxu1  ;;  %2489 = vmatprep.subr.bf16.mxu0 %v2437_v26  ;;  %2548 = vmatprep.subr.bf16.mxu1 %v2439_v59 }
 0x8ad   : > { %v2316_v36 = vpop.f32.mrb[125].mxu0  ;;  %v2389_v40 = vpop.f32.mrb[125].mxu1  ;;  %2490 = vmatpush1.bf16.msra.mxu0 %v2436_v35  ;;  %2549 = vmatpush1.bf16.msra.mxu1 %v2438_v33  ;;  %v2420_v37 = vmax.f32 %v2314_v60, 0.0  ;;  %v2422_v50 = vmax.f32 %v2387_v61, 0.0 }
 0x8ae   : > { %v2318_v41 = vpop.f32.mrb[126].mxu0  ;;  %v2391_v62 = vpop.f32.mrb[126].mxu1  ;;  %v2421_v4 = vmax.f32 %v2316_v36, 0.0  ;;  %v2423_v5 = vmax.f32 %v2389_v40, 0.0 }
 0x8af   : > { %v2424_v58 = vmax.f32 %v2318_v41, 0.0  ;;  %v2426_v63 = vmax.f32 %v2391_v62, 0.0  ;;  %v2320_v0 = vpop.f32.mrb[127].mxu0  ;;  %v2393_v3 = vpop.f32.mrb[127].mxu1 }
 0x8b0   : > { %v2425_v22 = vmax.f32 %v2320_v0, 0.0  ;;  %v2427_v6 = vmax.f32 %v2393_v3, 0.0 }
 0x8b1   : > { %v2440_v7 = vpack.c.bf16 %v2424_v58, %v2420_v37  ;;  %v2442_v8 = vpack.c.bf16 %v2426_v63, %v2422_v50 }
 0x8b2   : > { %v2441_v9 = vpack.c.bf16 %v2425_v22, %v2421_v4  ;;  %v2443_v2 = vpack.c.bf16 %v2427_v6, %v2423_v5 }
 0x8b4   : > { %2491 = vmatprep.subr.bf16.mxu0 %v2441_v9  ;;  %2550 = vmatprep.subr.bf16.mxu1 %v2443_v2 }
 0x8b5   : > { %2492 = vmatpush1.bf16.msra.mxu0 %v2440_v7  ;;  %2551 = vmatpush1.bf16.msra.mxu1 %v2442_v8 }
 0x8b8   : > { %2833 = vmatmul.mubr.msk.bf16.vlgmr.msra.gmra.mrb[128].mxu0 %vm592_vm0, %v2944_v10  ;;  %2837 = vmatmul.mubr.msk.bf16.vlgmr.msra.gmra.mrb[128].mxu1 %vm592_vm0, %v2944_v10 }
 0x8b9   : > { %2525 = vmatprep.mubr.bf16.mxu0 %v3048_v1  ;;  %2584 = vmatprep.mubr.bf16.mxu1 %v3048_v1 }
 0x8c0   : > { %2834 = vmatmul.mubr.msk.bf16.gmra.mrb[132].mxu0 %vm592_vm0, %v2945_v11  ;;  %2838 = vmatmul.mubr.msk.bf16.gmra.mrb[132].mxu1 %vm592_vm0, %v2945_v11 }
 0x8c1   : > { %2531 = vmatprep.mubr.bf16.mxu0 %v3048_v1  ;;  %2590 = vmatprep.mubr.bf16.mxu1 %v3048_v1 }
 0x8c8   : > { %2835 = vmatmul.mubr.msk.bf16.gmra.mrb[136].mxu0 %vm592_vm0, %v2946_v25  ;;  %2839 = vmatmul.mubr.msk.bf16.gmra.mrb[136].mxu1 %vm592_vm0, %v2946_v25 }
 0x8c9   : > { %2537 = vmatprep.mubr.bf16.mxu0 %v3048_v1  ;;  %2596 = vmatprep.mubr.bf16.mxu1 %v3048_v1 }
 0x8d0   : > { %2836 = vmatmul.mubr.msk.bf16.gmra.mrb[140].mxu0 %vm592_vm0, %v2947_v12  ;;  %2840 = vmatmul.mubr.msk.bf16.gmra.mrb[140].mxu1 %vm592_vm0, %v2947_v12 }
 0x98b   : > { %v2519_v27 = vpop.f32.mrb[128].mxu0  ;;  %v2578_v28 = vpop.f32.mrb[128].mxu1 }
 0x98c   : > { %v2521_v30 = vpop.f32.mrb[129].mxu0  ;;  %v2580_v31 = vpop.f32.mrb[129].mxu1 }
 0x98d   : > { %v2607_v16 = vcombine.low %v2519_v27, %v2521_v30  ;;  %v2608_v1 = vcombine.low %v2578_v28, %v2580_v31  ;;  %v2523_v17 = vpop.f32.mrb[130].mxu0  ;;  %v2582_v18 = vpop.f32.mrb[130].mxu1 }
 0x98e   : > { %v2524_v21 = vpop.f32.mrb[131].mxu0  ;;  %v2583_v32 = vpop.f32.mrb[131].mxu1 }
 0x98f   : > { %v2615_v42 = vrot.slane %v2607_v16, %v2614_v29  ;;  %v2622_v43 = vrot.slane %v2608_v1, %v2614_v29 }
 0x991   : > { %v2623_v24 = vcombine.low %v2615_v42, %v2622_v43 }
 0x993   : > { %v2630_v23 = vrot.slane %v2623_v24, %v2614_v29  ;;  %v2527_v44 = vpop.f32.mrb[132].mxu0  ;;  %v2586_v45 = vpop.f32.mrb[132].mxu1 }
 0x994   : > { %v2528_v46 = vpop.f32.mrb[133].mxu0  ;;  %v2587_v47 = vpop.f32.mrb[133].mxu1 }
 0x995   : > { %v2529_v48 = vpop.f32.mrb[134].mxu0  ;;  %v2588_v19 = vpop.f32.mrb[134].mxu1  ;;  %2636 = vst.msk [vmem:[%s206_s6] sm:$0xf] %vm2634_vm1, %v2630_v23 }
 0x996   : > { %v2530_v20 = vpop.f32.mrb[135].mxu0  ;;  %v2589_v49 = vpop.f32.mrb[135].mxu1 }
 0x997   : > { %2989 = shalt.err (!%p2986_p7)
}
 0x998   : > { %s2990_s20 = scalar_lea.hbm %s3492_s10, 64  ;;  %s2994_s28 = scalar_lea.hbm %s3540_s4, 128 }
 0x999   : > { %p2991_p8 = scmp.ne.s32.totalorder %s3492_s10, %s2990_s20  ;;  %p2995_p1 = scmp.lt.u32.totalorder %s3492_s10, %s3540_s4 }
 0x99a   : > { %p2996_p0 = scmp.lt.u32.totalorder %s2994_s28, %s2990_s20  ;;  %p2998_p6 = scmp.lt.u32.totalorder %s2990_s20, %s3492_s10 }
 0x99b   : > { %p2992_p11 = pnand %p2991_p8, %p3551_p9 }
 0x99c   : > { %p2997_p5 = por %p2996_p0, %p2995_p1 }
 0x99d   : > { %p2993_p13 = pneg %p2992_p11 }
 0x99e   : > { %p2999_p10 = por %p2998_p6, %p2997_p5 }
 0x9a0   : > { %p3000_p12 = pnand %p2999_p10, %p2993_p13 }
 0x9a2   : > { %3003 = shalt.err (!%p3000_p12)
}
 0x9a3   : > { %2851 = dma.vmem_to_hbm [thread:$0]  (%p3551_p9), %s3494_s7, 64, %s3492_s10, %s2638_s19   ;;  %v2533_v51 = vpop.f32.mrb[136].mxu0  ;;  %v2592_v52 = vpop.f32.mrb[136].mxu1 }
 0x9a4   : > { %v2534_v53 = vpop.f32.mrb[137].mxu0  ;;  %v2593_v54 = vpop.f32.mrb[137].mxu1 }
 0x9a5   : > { %v2535_v38 = vpop.f32.mrb[138].mxu0  ;;  %v2594_v55 = vpop.f32.mrb[138].mxu1 }
 0x9a6   : > { %v2536_v34 = vpop.f32.mrb[139].mxu0  ;;  %v2595_v56 = vpop.f32.mrb[139].mxu1 }
 0x9a7   : > { %v2539_v39 = vpop.f32.mrb[140].mxu0  ;;  %v2598_v57 = vpop.f32.mrb[140].mxu1 }
 0x9a8   : > { %v2540_v35 = vpop.f32.mrb[141].mxu0  ;;  %v2599_v33 = vpop.f32.mrb[141].mxu1 }
 0x9a9   : > { %v2541_v26 = vpop.f32.mrb[142].mxu0  ;;  %v2600_v59 = vpop.f32.mrb[142].mxu1 }
 0x9aa   : > { %v2542_v60 = vpop.f32.mrb[143].mxu0  ;;  %v2601_v61 = vpop.f32.mrb[143].mxu1 }
 0x9ab PF: > { %p2863_p9 = scmp.ge.s32.totalorder %s3042_s18, 2  ;;  %s2664_s25 = sand.u32 1, %s3030_s15  }
 0x9ac   : > { %p3552_p2 = scmp.ne.s32.totalorder %s3545_s26, 0  ;;  %s2665_s30 = scalar_lea.sflag [#allocation4], %s2664_s25 }
 0x9ae   : > { %p2858_p3 = pnand %p2863_p9, %p3552_p2 }
 0x9b0   : > { %3025 = dma.done.wait (!%p2858_p3), %s2665_s30, 64  }
 0x9b1   : > { %3027 = vsyncadd (!%p2858_p3), %s2665_s30, 4294967232  ;;  %p15_p4 = scmp.ge.s32.totalorder %s3101_s21, 4   ;;  %s3553_s15 = smov %s3034_s16 }
 0x9b2   : > { %s3554_s16 = smov %s3038_s17  ;;  %s3555_s17 = smov %s3112_s24 }
 0x9b3   : > { %s3556_s18 = smov %s3101_s21  ;;  %17 = sbr.rel (!%p15_p4) target bundleno = 4 (0x4), region = 85 }
 0x9ba   :  { %2670 = vsyncpa [#allocation3], 1 }
 0x9bb   :  { %2672 = vsyncpa [#allocation3 + $0x1], 1 }
 0x9bc   :  { %2673 = vsyncpa [#allocation4], 1 }
 0x9bd   :  { %2675 = vsyncpa [#allocation4 + $0x1], 1 }

</bundles_post_ra>
